<compile_context>
chip_gen: v7x
topology: tpu7x:2x2x1
jax: 0.10.0
libtpu: 0.0.40
codegen_flags: <defaults>
</compile_context>

<pallas_src>
import math
from functools import partial

import jax
import jax.numpy as jnp
from jax import lax
from jax.experimental import pallas as pl
from jax.experimental.pallas import tpu as pltpu


# TODO(synk): `gate_activation` is referenced but never defined in the source
# module; SiLU (x * sigmoid(x)) is used as the gate activation here.
def _gate_activation(v):
    return v * jax.nn.sigmoid(v)


def _pick_batch_tile(B, L):
    """Batch-tile size: fill MXU rows (<=256) but keep >=2 grid steps when
    possible so both v7x TensorCores get work (no-op on v5e/v6e)."""
    divisors = [d for d in range(1, B + 1) if B % d == 0]
    cands = [d for d in divisors if B // d >= 2] or divisors
    fitting = [d for d in cands if d * L <= 256]
    return max(fitting) if fitting else min(cands)


def _make_kernel(Bt, L, C, n, n_taps, p_max):
    inv_n = 1.0 / n
    inv_sqrt_L = 1.0 / math.sqrt(L)

    def kernel(x_ref, wcat_ref, bcat_ref, wq_ref, wqb_ref, wk_ref, wkb_ref,
               vwt_ref, vbc_ref, pos_ref, maskt_ref, out_ref):
        x = x_ref[...]                                        # (Bt, L, C) f32

        # ---- im2col slab: every tap side by side, built exactly once -------
        # (static slice + concat is used instead of pltpu.roll because it
        # lowers unconditionally; the handful of small realigning slices here
        # replaces the 9 per-branch misaligned slices of the old kernel.)
        taps = []
        for s in range(n_taps):
            d = s - p_max                                     # tap reads x[l + d]
            if d == 0:
                taps.append(x)
            elif d > 0:
                z = jnp.zeros((Bt, d, C), x.dtype)
                taps.append(jnp.concatenate([x[:, d:, :], z], axis=1))
            else:
                z = jnp.zeros((Bt, -d, C), x.dtype)
                taps.append(jnp.concatenate([z, x[:, :L + d, :]], axis=1))
        x_taps = jnp.concatenate(taps, axis=-1)               # (Bt, L, n_taps*C)
        x_taps = x_taps.reshape(Bt * L, n_taps * C).astype(jnp.bfloat16)

        # ---- every conv branch + masked branch-mean: one MXU call ----------
        res_cat = jnp.dot(x_taps, wcat_ref[...],
                          preferred_element_type=jnp.float32) + bcat_ref[...]
        res_mean = res_cat[:, n * C:]                         # (Bt*L, C)

        # ---- Q / K linear projections for the whole batch tile -------------
        x_center = x_taps[:, p_max * C:(p_max + 1) * C]       # == x, already bf16
        q_lin = jnp.dot(x_center, wq_ref[...],
                        preferred_element_type=jnp.float32) + wqb_ref[...]
        k_lin = jnp.dot(res_mean.astype(jnp.bfloat16), wk_ref[...],
                        preferred_element_type=jnp.float32) + wkb_ref[...]

        pos = pos_ref[...]                                    # (L, C)
        vwt = vwt_ref[...]                                    # (n, C) = V.weight
        vbc = vbc_ref[...]                                    # (n, 1)
        maskt = maskt_ref[...]                                # (n, C)

        # ---- per-batch-element channel attention (short unrolled loop) -----
        for b in range(Bt):
            rows = slice(b * L, (b + 1) * L)
            Qb = _gate_activation(q_lin[rows, :] + pos)       # (L, C)
            Kb = _gate_activation(k_lin[rows, :] + pos)       # (L, C)

            # qk[c, d] = sum_l Qb[l, c] * Kb[l, d]   (no materialized transpose)
            qk = lax.dot_general(
                Qb.astype(jnp.bfloat16), Kb.astype(jnp.bfloat16),
                dimension_numbers=(((0,), (0,)), ((), ())),
                preferred_element_type=jnp.float32) * inv_sqrt_L

            # softmax over the last axis (EUP approx reciprocal for the norm)
            qk = jnp.exp(qk - jnp.max(qk, axis=-1, keepdims=True))
            qk = qk * pl.reciprocal(jnp.sum(qk, axis=-1, keepdims=True),
                                    approx=True)

            # qkv_t[i, c] = sum_d V_w[i, d] * qk[c, d]   (again transpose-free)
            qkv_t = lax.dot_general(vwt, qk,
                                    dimension_numbers=(((1,), (1,)), ((), ())),
                                    preferred_element_type=jnp.float32)
            kw = _gate_activation(qkv_t + vbc) * maskt        # (n, C)

            # branch-weighted mean (dropout mask already folded into kw)
            acc = None
            for i in range(n):
                term = res_cat[rows, i * C:(i + 1) * C] * kw[i:i + 1, :]
                acc = term if acc is None else acc + term
            out_ref[b] = (acc * inv_n).astype(out_ref.dtype)

    return kernel


@partial(jax.jit, static_argnames=("kernel_sizes", "padding_lens"))
def multi_conv_layer(x, params, kernel_sizes, padding_lens):
    """x: (B, L, C) channels-last.  Eval-mode forward of MultiConvLayer."""
    B, L, C = x.shape
    n = len(kernel_sizes)
    p_max = max(padding_lens)
    for k, p in zip(kernel_sizes, padding_lens):
        assert L + 2 * p - k + 1 == L, "conv branches must preserve sequence length"
    n_taps = max(p_max - p + k for k, p in zip(kernel_sizes, padding_lens))
    Bt = _pick_batch_tile(B, L)

    mask = params['mask']                                     # (C, n)

    # Stack every per-tap / per-branch conv weight into one matmul operand and
    # append the mask-folded branch-mean as extra output columns.
    w_all = jnp.zeros((n_taps, C, n, C), jnp.float32)
    for i, (k, p) in enumerate(zip(kernel_sizes, padding_lens)):
        off = p_max - p
        w_all = w_all.at[off:off + k, :, i, :].set(params['conv_w'][i])
    w_mean = jnp.einsum('tcid,di->tcd', w_all, mask) / n      # (n_taps, C, C)
    w_cat = jnp.concatenate([w_all.reshape(n_taps, C, n * C), w_mean], axis=-1)
    w_cat = w_cat.reshape(n_taps * C, (n + 1) * C).astype(jnp.bfloat16)

    b_all = params['conv_b'].reshape(n * C)
    b_mean = (params['conv_b'] * mask.T).sum(axis=0) / n
    b_cat = jnp.concatenate([b_all, b_mean]).reshape(1, (n + 1) * C)

    inputs = [
        x,                                         # (B, L, C)  unpadded
        w_cat,                                     # (n_taps*C, (n+1)*C) bf16
        b_cat,                                     # (1, (n+1)*C)
        params['wq_w'].astype(jnp.bfloat16),       # (C, C)
        params['wq_b'].reshape(1, C),              # (1, C)
        params['wk_w'].astype(jnp.bfloat16),       # (C, C)
        params['wk_b'].reshape(1, C),              # (1, C)
        params['v_w'].T,                           # (n, C)
        params['v_b'].reshape(n, 1),               # (n, 1)
        params['pos_emb'],                         # (L, C)
        mask.T,                                    # (n, C)
    ]

    def const(shape):
        return pl.BlockSpec(shape, lambda b: (0, 0))

    in_specs = [pl.BlockSpec((Bt, L, C), lambda b: (b, 0, 0))]
    in_specs += [const(a.shape) for a in inputs[1:]]
    out_spec = pl.BlockSpec((Bt, L, C), lambda b: (b, 0, 0))

    kernel = _make_kernel(Bt, L, C, n, n_taps, p_max)

    return pl.pallas_call(
        kernel,
        out_shape=jax.ShapeDtypeStruct((B, L, C), x.dtype),
        grid_spec=pltpu.PrefetchScalarGridSpec(
            num_scalar_prefetch=0,
            grid=(B // Bt,),
            in_specs=in_specs,
            out_specs=out_spec,
        ),
        compiler_params=pltpu.CompilerParams(
            dimension_semantics=("parallel",),
            vmem_limit_bytes=32 * 1024 * 1024,
        ),
    )(*inputs)


def init_params(key, C, kernel_sizes, L):
    """Deterministic synthetic init matching the module's parameter shapes.
    conv_w[i] is stored as (k, C_in, C_out) = torch Conv1d weight.permute(2,1,0)."""
    n = len(kernel_sizes)
    keys = jax.random.split(key, n + 4)
    conv_w = [0.1 * jax.random.normal(keys[i], (k, C, C), jnp.float32)
              for i, k in enumerate(kernel_sizes)]
    conv_b = 0.1 * jax.random.normal(keys[n], (n, C), jnp.float32)

    wq_w = jnp.eye(C, dtype=jnp.float32)          # torch.diag(torch.ones(C))
    wq_b = jnp.zeros((C,), jnp.float32)
    wk_w = jnp.eye(C, dtype=jnp.float32)
    wk_b = jnp.zeros((C,), jnp.float32)

    bound_v = math.sqrt(6.0 / (C + n))            # xavier_uniform_, gain=1
    v_w = jax.random.uniform(keys[n + 1], (C, n), jnp.float32, -bound_v, bound_v)
    bound_b = 1.0 / math.sqrt(C)
    v_b = jax.random.uniform(keys[n + 2], (n,), jnp.float32, -bound_b, bound_b)

    bound_p = 1e-5 * math.sqrt(6.0 / (L + C))     # xavier_uniform_, gain=1e-5
    pos_emb = jax.random.uniform(keys[n + 3], (L, C), jnp.float32, -bound_p, bound_p)

    mask = jnp.ones((C, n), jnp.float32)          # dropout(mask) in eval mode
    return dict(conv_w=conv_w, conv_b=conv_b, wq_w=wq_w, wq_b=wq_b,
                wk_w=wk_w, wk_b=wk_b, v_w=v_w, v_b=v_b,
                pos_emb=pos_emb, mask=mask)


def reference(x, params, kernel_sizes, padding_lens):
    """Pure-JAX f32 replica of the PyTorch forward (eval mode) for verification."""
    B, L, C = x.shape
    n = len(kernel_sizes)
    res = []
    for i, (k, p) in enumerate(zip(kernel_sizes, padding_lens)):
        xp = jnp.pad(x, ((0, 0), (p, p), (0, 0)))
        y = jnp.zeros((B, L, C), jnp.float32)
        for t in range(k):
            y = y + jnp.einsum('blc,cd->bld', xp[:, t:t + L, :], params['conv_w'][i][t])
        res.append(y + params['conv_b'][i][None, None, :])
    res = jnp.stack(res, axis=-1)                        # (B, L, C, n)

    mask = params['mask']                                # (C, n)
    pos = params['pos_emb']
    Q = _gate_activation(x @ params['wq_w'] + params['wq_b'] + pos)
    K = _gate_activation((res * mask).mean(-1) @ params['wk_w'] + params['wk_b'] + pos)
    QK = jnp.einsum('blc,bld->bcd', Q, K) / math.sqrt(L)
    QK = jax.nn.softmax(QK, axis=-1)
    QKV = QK @ params['v_w'] + params['v_b']             # (B, C, n)
    kw = _gate_activation(QKV)[:, None, :, :]            # (B, 1, C, n)
    return (res * kw * mask).mean(-1)                    # (B, L, C)


if __name__ == "__main__":
    B, L, C = 8, 16, 32                 # batch, seq len (= pos_len), channels
    kernel_sizes = (1, 3, 5)
    padding_lens = (0, 1, 2)            # "same" padding so branches stack

    key = jax.random.PRNGKey(0)
    kx, kp = jax.random.split(key)
    x = jax.random.normal(kx, (B, L, C), jnp.float32)
    params = init_params(kp, C, kernel_sizes, L)

    out = multi_conv_layer(x, params, kernel_sizes=kernel_sizes,
                           padding_lens=padding_lens)
    out = jax.block_until_ready(out)

    ref = reference(x, params, kernel_sizes, padding_lens)
    assert out.shape == (B, L, C)
    err = float(jnp.max(jnp.abs(out - ref)))
    # matmul operands are bf16 (f32 accumulation), so tolerance is loosened
    # relative to the pure-f32 reference.
    assert jnp.allclose(out, ref, rtol=3e-2, atol=3e-2), f"max abs err = {err}"
    print("KERNEL_OK")
</pallas_src>

<mosaic_0001>
module attributes {stable_mosaic.version = 11 : i64} {
  func.func @kernel(%arg0: i32, %arg1: memref<4x16x32xf32, #tpu.memory_space<vmem>>, %arg2: memref<160x128xbf16, #tpu.memory_space<vmem>>, %arg3: memref<1x128xf32, #tpu.memory_space<vmem>>, %arg4: memref<32x32xbf16, #tpu.memory_space<vmem>>, %arg5: memref<1x32xf32, #tpu.memory_space<vmem>>, %arg6: memref<32x32xbf16, #tpu.memory_space<vmem>>, %arg7: memref<1x32xf32, #tpu.memory_space<vmem>>, %arg8: memref<3x32xf32, #tpu.memory_space<vmem>>, %arg9: memref<3x1xf32, #tpu.memory_space<vmem>>, %arg10: memref<16x32xf32, #tpu.memory_space<vmem>>, %arg11: memref<3x32xf32, #tpu.memory_space<vmem>>, %arg12: memref<4x16x32xf32, #tpu.memory_space<vmem>>) attributes {dimension_semantics = [#tpu.dimension_semantics<parallel>], iteration_bounds = array<i64: 2>, scalar_prefetch = 0 : i64, scratch_operands = 0 : i64, tpu.core_type = #tpu.core_type<tc>, window_params = [{transform_indices = @transform_0, window_bounds = array<i64: 4, 16, 32>}, {pipeline_mode = #tpu.pipeline_mode<synchronous>, transform_indices = @transform_1, window_bounds = array<i64: 160, 128>}, {pipeline_mode = #tpu.pipeline_mode<synchronous>, transform_indices = @transform_2, window_bounds = array<i64: 1, 128>}, {pipeline_mode = #tpu.pipeline_mode<synchronous>, transform_indices = @transform_3, window_bounds = array<i64: 32, 32>}, {pipeline_mode = #tpu.pipeline_mode<synchronous>, transform_indices = @transform_4, window_bounds = array<i64: 1, 32>}, {pipeline_mode = #tpu.pipeline_mode<synchronous>, transform_indices = @transform_5, window_bounds = array<i64: 32, 32>}, {pipeline_mode = #tpu.pipeline_mode<synchronous>, transform_indices = @transform_6, window_bounds = array<i64: 1, 32>}, {pipeline_mode = #tpu.pipeline_mode<synchronous>, transform_indices = @transform_7, window_bounds = array<i64: 3, 32>}, {pipeline_mode = #tpu.pipeline_mode<synchronous>, transform_indices = @transform_8, window_bounds = array<i64: 3, 1>}, {pipeline_mode = #tpu.pipeline_mode<synchronous>, transform_indices = @transform_9, window_bounds = array<i64: 16, 32>}, {pipeline_mode = #tpu.pipeline_mode<synchronous>, transform_indices = @transform_10, window_bounds = array<i64: 3, 32>}, {transform_indices = @transform_11, window_bounds = array<i64: 4, 16, 32>}]} {
    %c0 = arith.constant 0 : index
    %c0_0 = arith.constant 0 : index
    %c0_1 = arith.constant 0 : index
    %0 = vector.load %arg1[%c0, %c0_0, %c0_1] : memref<4x16x32xf32, #tpu.memory_space<vmem>>, vector<4x16x32xf32>
    %cst = arith.constant 0.000000e+00 : f32
    %1 = vector.broadcast %cst : f32 to vector<4x2x32xf32>
    %2 = vector.extract_strided_slice %0 {offsets = [0, 0, 0], sizes = [4, 14, 32], strides = [1, 1, 1]} : vector<4x16x32xf32> to vector<4x14x32xf32>
    %3 = tpu.concatenate %1, %2 in 1 : vector<4x2x32xf32>, vector<4x14x32xf32> -> vector<4x16x32xf32>
    %cst_2 = arith.constant 0.000000e+00 : f32
    %4 = vector.broadcast %cst_2 : f32 to vector<4x1x32xf32>
    %5 = vector.extract_strided_slice %0 {offsets = [0, 0, 0], sizes = [4, 15, 32], strides = [1, 1, 1]} : vector<4x16x32xf32> to vector<4x15x32xf32>
    %6 = tpu.concatenate %4, %5 in 1 : vector<4x1x32xf32>, vector<4x15x32xf32> -> vector<4x16x32xf32>
    %cst_3 = arith.constant 0.000000e+00 : f32
    %7 = vector.broadcast %cst_3 : f32 to vector<4x1x32xf32>
    %8 = vector.extract_strided_slice %0 {offsets = [0, 1, 0], sizes = [4, 15, 32], strides = [1, 1, 1]} : vector<4x16x32xf32> to vector<4x15x32xf32>
    %9 = tpu.concatenate %8, %7 in 1 : vector<4x15x32xf32>, vector<4x1x32xf32> -> vector<4x16x32xf32>
    %cst_4 = arith.constant 0.000000e+00 : f32
    %10 = vector.broadcast %cst_4 : f32 to vector<4x2x32xf32>
    %11 = vector.extract_strided_slice %0 {offsets = [0, 2, 0], sizes = [4, 14, 32], strides = [1, 1, 1]} : vector<4x16x32xf32> to vector<4x14x32xf32>
    %12 = tpu.concatenate %11, %10 in 1 : vector<4x14x32xf32>, vector<4x2x32xf32> -> vector<4x16x32xf32>
    %13 = tpu.concatenate %3, %6, %0, %9, %12 in 2 : vector<4x16x32xf32>, vector<4x16x32xf32>, vector<4x16x32xf32>, vector<4x16x32xf32>, vector<4x16x32xf32> -> vector<4x16x160xf32>
    %14 = vector.shape_cast %13 : vector<4x16x160xf32> to vector<64x160xf32>
    %15 = arith.truncf %14 : vector<64x160xf32> to vector<64x160xbf16>
    %c0_5 = arith.constant 0 : index
    %c0_6 = arith.constant 0 : index
    %16 = vector.load %arg2[%c0_5, %c0_6] : memref<160x128xbf16, #tpu.memory_space<vmem>>, vector<160x128xbf16>
    %cst_7 = arith.constant dense<0.000000e+00> : vector<64x128xf32>
    %17 = tpu.matmul %15, %16, %cst_7 {dimension_numbers = #tpu.dot_dimension_numbers<[1], [0], [0], [1], [0, 0, 1, 1], [], []>} : vector<64x160xbf16>, vector<160x128xbf16>, vector<64x128xf32> -> vector<64x128xf32>
    %c0_8 = arith.constant 0 : index
    %c0_9 = arith.constant 0 : index
    %18 = vector.load %arg3[%c0_8, %c0_9] : memref<1x128xf32, #tpu.memory_space<vmem>>, vector<1x128xf32>
    %19 = vector.broadcast %18 : vector<1x128xf32> to vector<64x128xf32>
    %20 = arith.addf %17, %19 : vector<64x128xf32>
    %21 = vector.extract_strided_slice %20 {offsets = [0, 96], sizes = [64, 32], strides = [1, 1]} : vector<64x128xf32> to vector<64x32xf32>
    %22 = vector.extract_strided_slice %15 {offsets = [0, 64], sizes = [64, 32], strides = [1, 1]} : vector<64x160xbf16> to vector<64x32xbf16>
    %c0_10 = arith.constant 0 : index
    %c0_11 = arith.constant 0 : index
    %23 = vector.load %arg4[%c0_10, %c0_11] : memref<32x32xbf16, #tpu.memory_space<vmem>>, vector<32x32xbf16>
    %cst_12 = arith.constant dense<0.000000e+00> : vector<64x32xf32>
    %24 = tpu.matmul %22, %23, %cst_12 {dimension_numbers = #tpu.dot_dimension_numbers<[1], [0], [0], [1], [0, 0, 1, 1], [], []>} : vector<64x32xbf16>, vector<32x32xbf16>, vector<64x32xf32> -> vector<64x32xf32>
    %c0_13 = arith.constant 0 : index
    %c0_14 = arith.constant 0 : index
    %25 = vector.load %arg5[%c0_13, %c0_14] : memref<1x32xf32, #tpu.memory_space<vmem>>, vector<1x32xf32>
    %26 = vector.broadcast %25 : vector<1x32xf32> to vector<64x32xf32>
    %27 = arith.addf %24, %26 : vector<64x32xf32>
    %28 = arith.truncf %21 : vector<64x32xf32> to vector<64x32xbf16>
    %c0_15 = arith.constant 0 : index
    %c0_16 = arith.constant 0 : index
    %29 = vector.load %arg6[%c0_15, %c0_16] : memref<32x32xbf16, #tpu.memory_space<vmem>>, vector<32x32xbf16>
    %cst_17 = arith.constant dense<0.000000e+00> : vector<64x32xf32>
    %30 = tpu.matmul %28, %29, %cst_17 {dimension_numbers = #tpu.dot_dimension_numbers<[1], [0], [0], [1], [0, 0, 1, 1], [], []>} : vector<64x32xbf16>, vector<32x32xbf16>, vector<64x32xf32> -> vector<64x32xf32>
    %c0_18 = arith.constant 0 : index
    %c0_19 = arith.constant 0 : index
    %31 = vector.load %arg7[%c0_18, %c0_19] : memref<1x32xf32, #tpu.memory_space<vmem>>, vector<1x32xf32>
    %32 = vector.broadcast %31 : vector<1x32xf32> to vector<64x32xf32>
    %33 = arith.addf %30, %32 : vector<64x32xf32>
    %c0_20 = arith.constant 0 : index
    %c0_21 = arith.constant 0 : index
    %34 = vector.load %arg10[%c0_20, %c0_21] : memref<16x32xf32, #tpu.memory_space<vmem>>, vector<16x32xf32>
    %c0_22 = arith.constant 0 : index
    %c0_23 = arith.constant 0 : index
    %35 = vector.load %arg8[%c0_22, %c0_23] : memref<3x32xf32, #tpu.memory_space<vmem>>, vector<3x32xf32>
    %c0_24 = arith.constant 0 : index
    %c0_25 = arith.constant 0 : index
    %36 = vector.load %arg9[%c0_24, %c0_25] : memref<3x1xf32, #tpu.memory_space<vmem>>, vector<3x1xf32>
    %c0_26 = arith.constant 0 : index
    %c0_27 = arith.constant 0 : index
    %37 = vector.load %arg11[%c0_26, %c0_27] : memref<3x32xf32, #tpu.memory_space<vmem>>, vector<3x32xf32>
    %38 = vector.extract_strided_slice %27 {offsets = [0, 0], sizes = [16, 32], strides = [1, 1]} : vector<64x32xf32> to vector<16x32xf32>
    %39 = arith.addf %38, %34 : vector<16x32xf32>
    %40 = arith.negf %39 : vector<16x32xf32>
    %41 = math.exp %40 : vector<16x32xf32>
    %cst_28 = arith.constant 1.000000e+00 : f32
    %42 = vector.broadcast %cst_28 : f32 to vector<16x32xf32>
    %43 = arith.addf %42, %41 : vector<16x32xf32>
    %44 = arith.divf %42, %43 : vector<16x32xf32>
    %45 = arith.mulf %39, %44 : vector<16x32xf32>
    %46 = vector.extract_strided_slice %33 {offsets = [0, 0], sizes = [16, 32], strides = [1, 1]} : vector<64x32xf32> to vector<16x32xf32>
    %47 = arith.addf %46, %34 : vector<16x32xf32>
    %48 = arith.negf %47 : vector<16x32xf32>
    %49 = math.exp %48 : vector<16x32xf32>
    %cst_29 = arith.constant 1.000000e+00 : f32
    %50 = vector.broadcast %cst_29 : f32 to vector<16x32xf32>
    %51 = arith.addf %50, %49 : vector<16x32xf32>
    %52 = arith.divf %50, %51 : vector<16x32xf32>
    %53 = arith.mulf %47, %52 : vector<16x32xf32>
    %54 = arith.truncf %45 : vector<16x32xf32> to vector<16x32xbf16>
    %55 = arith.truncf %53 : vector<16x32xf32> to vector<16x32xbf16>
    %cst_30 = arith.constant dense<0.000000e+00> : vector<32x32xf32>
    %56 = tpu.matmul %54, %55, %cst_30 {dimension_numbers = #tpu.dot_dimension_numbers<[0], [0], [1], [1], [0, 1, 1, 1], [], []>} : vector<16x32xbf16>, vector<16x32xbf16>, vector<32x32xf32> -> vector<32x32xf32>
    %cst_31 = arith.constant 2.500000e-01 : f32
    %57 = vector.broadcast %cst_31 : f32 to vector<32x32xf32>
    %58 = arith.mulf %56, %57 : vector<32x32xf32>
    %cst_32 = arith.constant dense<0xFF800000> : vector<32xf32>
    %59 = vector.multi_reduction <maximumf>, %58, %cst_32 [1] : vector<32x32xf32> to vector<32xf32>
    %60 = vector.shape_cast %59 : vector<32xf32> to vector<32x1xf32>
    %61 = vector.broadcast %60 : vector<32x1xf32> to vector<32x32xf32>
    %62 = arith.subf %58, %61 : vector<32x32xf32>
    %63 = math.exp %62 : vector<32x32xf32>
    %cst_33 = arith.constant dense<0.000000e+00> : vector<32xf32>
    %64 = vector.multi_reduction <add>, %63, %cst_33 [1] : vector<32x32xf32> to vector<32xf32>
    %65 = vector.shape_cast %64 : vector<32xf32> to vector<32x1xf32>
    %66 = tpu.reciprocal %65 {approx = true} : vector<32x1xf32> -> vector<32x1xf32>
    %67 = vector.broadcast %66 : vector<32x1xf32> to vector<32x32xf32>
    %68 = arith.mulf %63, %67 : vector<32x32xf32>
    %cst_34 = arith.constant dense<0.000000e+00> : vector<3x32xf32>
    %69 = tpu.matmul %35, %68, %cst_34 {dimension_numbers = #tpu.dot_dimension_numbers<[1], [1], [0], [0], [0, 0, 1, 0], [], []>} : vector<3x32xf32>, vector<32x32xf32>, vector<3x32xf32> -> vector<3x32xf32>
    %70 = vector.broadcast %36 : vector<3x1xf32> to vector<3x32xf32>
    %71 = arith.addf %69, %70 : vector<3x32xf32>
    %72 = arith.negf %71 : vector<3x32xf32>
    %73 = math.exp %72 : vector<3x32xf32>
    %cst_35 = arith.constant 1.000000e+00 : f32
    %74 = vector.broadcast %cst_35 : f32 to vector<3x32xf32>
    %75 = arith.addf %74, %73 : vector<3x32xf32>
    %76 = arith.divf %74, %75 : vector<3x32xf32>
    %77 = arith.mulf %71, %76 : vector<3x32xf32>
    %78 = arith.mulf %77, %37 : vector<3x32xf32>
    %79 = vector.extract_strided_slice %20 {offsets = [0, 0], sizes = [16, 32], strides = [1, 1]} : vector<64x128xf32> to vector<16x32xf32>
    %80 = vector.extract_strided_slice %78 {offsets = [0, 0], sizes = [1, 32], strides = [1, 1]} : vector<3x32xf32> to vector<1x32xf32>
    %81 = vector.broadcast %80 : vector<1x32xf32> to vector<16x32xf32>
    %82 = arith.mulf %79, %81 : vector<16x32xf32>
    %83 = vector.extract_strided_slice %20 {offsets = [0, 32], sizes = [16, 32], strides = [1, 1]} : vector<64x128xf32> to vector<16x32xf32>
    %84 = vector.extract_strided_slice %78 {offsets = [1, 0], sizes = [1, 32], strides = [1, 1]} : vector<3x32xf32> to vector<1x32xf32>
    %85 = vector.broadcast %84 : vector<1x32xf32> to vector<16x32xf32>
    %86 = arith.mulf %83, %85 : vector<16x32xf32>
    %87 = arith.addf %82, %86 : vector<16x32xf32>
    %88 = vector.extract_strided_slice %20 {offsets = [0, 64], sizes = [16, 32], strides = [1, 1]} : vector<64x128xf32> to vector<16x32xf32>
    %89 = vector.extract_strided_slice %78 {offsets = [2, 0], sizes = [1, 32], strides = [1, 1]} : vector<3x32xf32> to vector<1x32xf32>
    %90 = vector.broadcast %89 : vector<1x32xf32> to vector<16x32xf32>
    %91 = arith.mulf %88, %90 : vector<16x32xf32>
    %92 = arith.addf %87, %91 : vector<16x32xf32>
    %cst_36 = arith.constant 0.333333343 : f32
    %93 = vector.broadcast %cst_36 : f32 to vector<16x32xf32>
    %94 = arith.mulf %92, %93 : vector<16x32xf32>
    %c0_37 = arith.constant 0 : index
    %c0_38 = arith.constant 0 : index
    %c0_39 = arith.constant 0 : index
    %95 = vector.load %arg12[%c0_37, %c0_38, %c0_39] : memref<4x16x32xf32, #tpu.memory_space<vmem>>, vector<1x16x32xf32>
    %96 = vector.shape_cast %95 : vector<1x16x32xf32> to vector<16x32xf32>
    %97 = vector.shape_cast %94 : vector<16x32xf32> to vector<1x16x32xf32>
    tpu.vector_store %arg12[%c0_37, %c0_38, %c0_39], %97 {strides = array<i32>} : memref<4x16x32xf32, #tpu.memory_space<vmem>>, vector<1x16x32xf32>,
    %98 = vector.extract_strided_slice %27 {offsets = [16, 0], sizes = [16, 32], strides = [1, 1]} : vector<64x32xf32> to vector<16x32xf32>
    %99 = arith.addf %98, %34 : vector<16x32xf32>
    %100 = arith.negf %99 : vector<16x32xf32>
    %101 = math.exp %100 : vector<16x32xf32>
    %cst_40 = arith.constant 1.000000e+00 : f32
    %102 = vector.broadcast %cst_40 : f32 to vector<16x32xf32>
    %103 = arith.addf %102, %101 : vector<16x32xf32>
    %104 = arith.divf %102, %103 : vector<16x32xf32>
    %105 = arith.mulf %99, %104 : vector<16x32xf32>
    %106 = vector.extract_strided_slice %33 {offsets = [16, 0], sizes = [16, 32], strides = [1, 1]} : vector<64x32xf32> to vector<16x32xf32>
    %107 = arith.addf %106, %34 : vector<16x32xf32>
    %108 = arith.negf %107 : vector<16x32xf32>
    %109 = math.exp %108 : vector<16x32xf32>
    %cst_41 = arith.constant 1.000000e+00 : f32
    %110 = vector.broadcast %cst_41 : f32 to vector<16x32xf32>
    %111 = arith.addf %110, %109 : vector<16x32xf32>
    %112 = arith.divf %110, %111 : vector<16x32xf32>
    %113 = arith.mulf %107, %112 : vector<16x32xf32>
    %114 = arith.truncf %105 : vector<16x32xf32> to vector<16x32xbf16>
    %115 = arith.truncf %113 : vector<16x32xf32> to vector<16x32xbf16>
    %cst_42 = arith.constant dense<0.000000e+00> : vector<32x32xf32>
    %116 = tpu.matmul %114, %115, %cst_42 {dimension_numbers = #tpu.dot_dimension_numbers<[0], [0], [1], [1], [0, 1, 1, 1], [], []>} : vector<16x32xbf16>, vector<16x32xbf16>, vector<32x32xf32> -> vector<32x32xf32>
    %cst_43 = arith.constant 2.500000e-01 : f32
    %117 = vector.broadcast %cst_43 : f32 to vector<32x32xf32>
    %118 = arith.mulf %116, %117 : vector<32x32xf32>
    %cst_44 = arith.constant dense<0xFF800000> : vector<32xf32>
    %119 = vector.multi_reduction <maximumf>, %118, %cst_44 [1] : vector<32x32xf32> to vector<32xf32>
    %120 = vector.shape_cast %119 : vector<32xf32> to vector<32x1xf32>
    %121 = vector.broadcast %120 : vector<32x1xf32> to vector<32x32xf32>
    %122 = arith.subf %118, %121 : vector<32x32xf32>
    %123 = math.exp %122 : vector<32x32xf32>
    %cst_45 = arith.constant dense<0.000000e+00> : vector<32xf32>
    %124 = vector.multi_reduction <add>, %123, %cst_45 [1] : vector<32x32xf32> to vector<32xf32>
    %125 = vector.shape_cast %124 : vector<32xf32> to vector<32x1xf32>
    %126 = tpu.reciprocal %125 {approx = true} : vector<32x1xf32> -> vector<32x1xf32>
    %127 = vector.broadcast %126 : vector<32x1xf32> to vector<32x32xf32>
    %128 = arith.mulf %123, %127 : vector<32x32xf32>
    %cst_46 = arith.constant dense<0.000000e+00> : vector<3x32xf32>
    %129 = tpu.matmul %35, %128, %cst_46 {dimension_numbers = #tpu.dot_dimension_numbers<[1], [1], [0], [0], [0, 0, 1, 0], [], []>} : vector<3x32xf32>, vector<32x32xf32>, vector<3x32xf32> -> vector<3x32xf32>
    %130 = vector.broadcast %36 : vector<3x1xf32> to vector<3x32xf32>
    %131 = arith.addf %129, %130 : vector<3x32xf32>
    %132 = arith.negf %131 : vector<3x32xf32>
    %133 = math.exp %132 : vector<3x32xf32>
    %cst_47 = arith.constant 1.000000e+00 : f32
    %134 = vector.broadcast %cst_47 : f32 to vector<3x32xf32>
    %135 = arith.addf %134, %133 : vector<3x32xf32>
    %136 = arith.divf %134, %135 : vector<3x32xf32>
    %137 = arith.mulf %131, %136 : vector<3x32xf32>
    %138 = arith.mulf %137, %37 : vector<3x32xf32>
    %139 = vector.extract_strided_slice %20 {offsets = [16, 0], sizes = [16, 32], strides = [1, 1]} : vector<64x128xf32> to vector<16x32xf32>
    %140 = vector.extract_strided_slice %138 {offsets = [0, 0], sizes = [1, 32], strides = [1, 1]} : vector<3x32xf32> to vector<1x32xf32>
    %141 = vector.broadcast %140 : vector<1x32xf32> to vector<16x32xf32>
    %142 = arith.mulf %139, %141 : vector<16x32xf32>
    %143 = vector.extract_strided_slice %20 {offsets = [16, 32], sizes = [16, 32], strides = [1, 1]} : vector<64x128xf32> to vector<16x32xf32>
    %144 = vector.extract_strided_slice %138 {offsets = [1, 0], sizes = [1, 32], strides = [1, 1]} : vector<3x32xf32> to vector<1x32xf32>
    %145 = vector.broadcast %144 : vector<1x32xf32> to vector<16x32xf32>
    %146 = arith.mulf %143, %145 : vector<16x32xf32>
    %147 = arith.addf %142, %146 : vector<16x32xf32>
    %148 = vector.extract_strided_slice %20 {offsets = [16, 64], sizes = [16, 32], strides = [1, 1]} : vector<64x128xf32> to vector<16x32xf32>
    %149 = vector.extract_strided_slice %138 {offsets = [2, 0], sizes = [1, 32], strides = [1, 1]} : vector<3x32xf32> to vector<1x32xf32>
    %150 = vector.broadcast %149 : vector<1x32xf32> to vector<16x32xf32>
    %151 = arith.mulf %148, %150 : vector<16x32xf32>
    %152 = arith.addf %147, %151 : vector<16x32xf32>
    %cst_48 = arith.constant 0.333333343 : f32
    %153 = vector.broadcast %cst_48 : f32 to vector<16x32xf32>
    %154 = arith.mulf %152, %153 : vector<16x32xf32>
    %c1 = arith.constant 1 : index
    %c0_49 = arith.constant 0 : index
    %c0_50 = arith.constant 0 : index
    %155 = vector.load %arg12[%c1, %c0_49, %c0_50] : memref<4x16x32xf32, #tpu.memory_space<vmem>>, vector<1x16x32xf32>
    %156 = vector.shape_cast %155 : vector<1x16x32xf32> to vector<16x32xf32>
    %157 = vector.shape_cast %154 : vector<16x32xf32> to vector<1x16x32xf32>
    tpu.vector_store %arg12[%c1, %c0_49, %c0_50], %157 {strides = array<i32>} : memref<4x16x32xf32, #tpu.memory_space<vmem>>, vector<1x16x32xf32>,
    %158 = vector.extract_strided_slice %27 {offsets = [32, 0], sizes = [16, 32], strides = [1, 1]} : vector<64x32xf32> to vector<16x32xf32>
    %159 = arith.addf %158, %34 : vector<16x32xf32>
    %160 = arith.negf %159 : vector<16x32xf32>
    %161 = math.exp %160 : vector<16x32xf32>
    %cst_51 = arith.constant 1.000000e+00 : f32
    %162 = vector.broadcast %cst_51 : f32 to vector<16x32xf32>
    %163 = arith.addf %162, %161 : vector<16x32xf32>
    %164 = arith.divf %162, %163 : vector<16x32xf32>
    %165 = arith.mulf %159, %164 : vector<16x32xf32>
    %166 = vector.extract_strided_slice %33 {offsets = [32, 0], sizes = [16, 32], strides = [1, 1]} : vector<64x32xf32> to vector<16x32xf32>
    %167 = arith.addf %166, %34 : vector<16x32xf32>
    %168 = arith.negf %167 : vector<16x32xf32>
    %169 = math.exp %168 : vector<16x32xf32>
    %cst_52 = arith.constant 1.000000e+00 : f32
    %170 = vector.broadcast %cst_52 : f32 to vector<16x32xf32>
    %171 = arith.addf %170, %169 : vector<16x32xf32>
    %172 = arith.divf %170, %171 : vector<16x32xf32>
    %173 = arith.mulf %167, %172 : vector<16x32xf32>
    %174 = arith.truncf %165 : vector<16x32xf32> to vector<16x32xbf16>
    %175 = arith.truncf %173 : vector<16x32xf32> to vector<16x32xbf16>
    %cst_53 = arith.constant dense<0.000000e+00> : vector<32x32xf32>
    %176 = tpu.matmul %174, %175, %cst_53 {dimension_numbers = #tpu.dot_dimension_numbers<[0], [0], [1], [1], [0, 1, 1, 1], [], []>} : vector<16x32xbf16>, vector<16x32xbf16>, vector<32x32xf32> -> vector<32x32xf32>
    %cst_54 = arith.constant 2.500000e-01 : f32
    %177 = vector.broadcast %cst_54 : f32 to vector<32x32xf32>
    %178 = arith.mulf %176, %177 : vector<32x32xf32>
    %cst_55 = arith.constant dense<0xFF800000> : vector<32xf32>
    %179 = vector.multi_reduction <maximumf>, %178, %cst_55 [1] : vector<32x32xf32> to vector<32xf32>
    %180 = vector.shape_cast %179 : vector<32xf32> to vector<32x1xf32>
    %181 = vector.broadcast %180 : vector<32x1xf32> to vector<32x32xf32>
    %182 = arith.subf %178, %181 : vector<32x32xf32>
    %183 = math.exp %182 : vector<32x32xf32>
    %cst_56 = arith.constant dense<0.000000e+00> : vector<32xf32>
    %184 = vector.multi_reduction <add>, %183, %cst_56 [1] : vector<32x32xf32> to vector<32xf32>
    %185 = vector.shape_cast %184 : vector<32xf32> to vector<32x1xf32>
    %186 = tpu.reciprocal %185 {approx = true} : vector<32x1xf32> -> vector<32x1xf32>
    %187 = vector.broadcast %186 : vector<32x1xf32> to vector<32x32xf32>
    %188 = arith.mulf %183, %187 : vector<32x32xf32>
    %cst_57 = arith.constant dense<0.000000e+00> : vector<3x32xf32>
    %189 = tpu.matmul %35, %188, %cst_57 {dimension_numbers = #tpu.dot_dimension_numbers<[1], [1], [0], [0], [0, 0, 1, 0], [], []>} : vector<3x32xf32>, vector<32x32xf32>, vector<3x32xf32> -> vector<3x32xf32>
    %190 = vector.broadcast %36 : vector<3x1xf32> to vector<3x32xf32>
    %191 = arith.addf %189, %190 : vector<3x32xf32>
    %192 = arith.negf %191 : vector<3x32xf32>
    %193 = math.exp %192 : vector<3x32xf32>
    %cst_58 = arith.constant 1.000000e+00 : f32
    %194 = vector.broadcast %cst_58 : f32 to vector<3x32xf32>
    %195 = arith.addf %194, %193 : vector<3x32xf32>
    %196 = arith.divf %194, %195 : vector<3x32xf32>
    %197 = arith.mulf %191, %196 : vector<3x32xf32>
    %198 = arith.mulf %197, %37 : vector<3x32xf32>
    %199 = vector.extract_strided_slice %20 {offsets = [32, 0], sizes = [16, 32], strides = [1, 1]} : vector<64x128xf32> to vector<16x32xf32>
    %200 = vector.extract_strided_slice %198 {offsets = [0, 0], sizes = [1, 32], strides = [1, 1]} : vector<3x32xf32> to vector<1x32xf32>
    %201 = vector.broadcast %200 : vector<1x32xf32> to vector<16x32xf32>
    %202 = arith.mulf %199, %201 : vector<16x32xf32>
    %203 = vector.extract_strided_slice %20 {offsets = [32, 32], sizes = [16, 32], strides = [1, 1]} : vector<64x128xf32> to vector<16x32xf32>
    %204 = vector.extract_strided_slice %198 {offsets = [1, 0], sizes = [1, 32], strides = [1, 1]} : vector<3x32xf32> to vector<1x32xf32>
    %205 = vector.broadcast %204 : vector<1x32xf32> to vector<16x32xf32>
    %206 = arith.mulf %203, %205 : vector<16x32xf32>
    %207 = arith.addf %202, %206 : vector<16x32xf32>
    %208 = vector.extract_strided_slice %20 {offsets = [32, 64], sizes = [16, 32], strides = [1, 1]} : vector<64x128xf32> to vector<16x32xf32>
    %209 = vector.extract_strided_slice %198 {offsets = [2, 0], sizes = [1, 32], strides = [1, 1]} : vector<3x32xf32> to vector<1x32xf32>
    %210 = vector.broadcast %209 : vector<1x32xf32> to vector<16x32xf32>
    %211 = arith.mulf %208, %210 : vector<16x32xf32>
    %212 = arith.addf %207, %211 : vector<16x32xf32>
    %cst_59 = arith.constant 0.333333343 : f32
    %213 = vector.broadcast %cst_59 : f32 to vector<16x32xf32>
    %214 = arith.mulf %212, %213 : vector<16x32xf32>
    %c2 = arith.constant 2 : index
    %c0_60 = arith.constant 0 : index
    %c0_61 = arith.constant 0 : index
    %215 = vector.load %arg12[%c2, %c0_60, %c0_61] : memref<4x16x32xf32, #tpu.memory_space<vmem>>, vector<1x16x32xf32>
    %216 = vector.shape_cast %215 : vector<1x16x32xf32> to vector<16x32xf32>
    %217 = vector.shape_cast %214 : vector<16x32xf32> to vector<1x16x32xf32>
    tpu.vector_store %arg12[%c2, %c0_60, %c0_61], %217 {strides = array<i32>} : memref<4x16x32xf32, #tpu.memory_space<vmem>>, vector<1x16x32xf32>,
    %218 = vector.extract_strided_slice %27 {offsets = [48, 0], sizes = [16, 32], strides = [1, 1]} : vector<64x32xf32> to vector<16x32xf32>
    %219 = arith.addf %218, %34 : vector<16x32xf32>
    %220 = arith.negf %219 : vector<16x32xf32>
    %221 = math.exp %220 : vector<16x32xf32>
    %cst_62 = arith.constant 1.000000e+00 : f32
    %222 = vector.broadcast %cst_62 : f32 to vector<16x32xf32>
    %223 = arith.addf %222, %221 : vector<16x32xf32>
    %224 = arith.divf %222, %223 : vector<16x32xf32>
    %225 = arith.mulf %219, %224 : vector<16x32xf32>
    %226 = vector.extract_strided_slice %33 {offsets = [48, 0], sizes = [16, 32], strides = [1, 1]} : vector<64x32xf32> to vector<16x32xf32>
    %227 = arith.addf %226, %34 : vector<16x32xf32>
    %228 = arith.negf %227 : vector<16x32xf32>
    %229 = math.exp %228 : vector<16x32xf32>
    %cst_63 = arith.constant 1.000000e+00 : f32
    %230 = vector.broadcast %cst_63 : f32 to vector<16x32xf32>
    %231 = arith.addf %230, %229 : vector<16x32xf32>
    %232 = arith.divf %230, %231 : vector<16x32xf32>
    %233 = arith.mulf %227, %232 : vector<16x32xf32>
    %234 = arith.truncf %225 : vector<16x32xf32> to vector<16x32xbf16>
    %235 = arith.truncf %233 : vector<16x32xf32> to vector<16x32xbf16>
    %cst_64 = arith.constant dense<0.000000e+00> : vector<32x32xf32>
    %236 = tpu.matmul %234, %235, %cst_64 {dimension_numbers = #tpu.dot_dimension_numbers<[0], [0], [1], [1], [0, 1, 1, 1], [], []>} : vector<16x32xbf16>, vector<16x32xbf16>, vector<32x32xf32> -> vector<32x32xf32>
    %cst_65 = arith.constant 2.500000e-01 : f32
    %237 = vector.broadcast %cst_65 : f32 to vector<32x32xf32>
    %238 = arith.mulf %236, %237 : vector<32x32xf32>
    %cst_66 = arith.constant dense<0xFF800000> : vector<32xf32>
    %239 = vector.multi_reduction <maximumf>, %238, %cst_66 [1] : vector<32x32xf32> to vector<32xf32>
    %240 = vector.shape_cast %239 : vector<32xf32> to vector<32x1xf32>
    %241 = vector.broadcast %240 : vector<32x1xf32> to vector<32x32xf32>
    %242 = arith.subf %238, %241 : vector<32x32xf32>
    %243 = math.exp %242 : vector<32x32xf32>
    %cst_67 = arith.constant dense<0.000000e+00> : vector<32xf32>
    %244 = vector.multi_reduction <add>, %243, %cst_67 [1] : vector<32x32xf32> to vector<32xf32>
    %245 = vector.shape_cast %244 : vector<32xf32> to vector<32x1xf32>
    %246 = tpu.reciprocal %245 {approx = true} : vector<32x1xf32> -> vector<32x1xf32>
    %247 = vector.broadcast %246 : vector<32x1xf32> to vector<32x32xf32>
    %248 = arith.mulf %243, %247 : vector<32x32xf32>
    %cst_68 = arith.constant dense<0.000000e+00> : vector<3x32xf32>
    %249 = tpu.matmul %35, %248, %cst_68 {dimension_numbers = #tpu.dot_dimension_numbers<[1], [1], [0], [0], [0, 0, 1, 0], [], []>} : vector<3x32xf32>, vector<32x32xf32>, vector<3x32xf32> -> vector<3x32xf32>
    %250 = vector.broadcast %36 : vector<3x1xf32> to vector<3x32xf32>
    %251 = arith.addf %249, %250 : vector<3x32xf32>
    %252 = arith.negf %251 : vector<3x32xf32>
    %253 = math.exp %252 : vector<3x32xf32>
    %cst_69 = arith.constant 1.000000e+00 : f32
    %254 = vector.broadcast %cst_69 : f32 to vector<3x32xf32>
    %255 = arith.addf %254, %253 : vector<3x32xf32>
    %256 = arith.divf %254, %255 : vector<3x32xf32>
    %257 = arith.mulf %251, %256 : vector<3x32xf32>
    %258 = arith.mulf %257, %37 : vector<3x32xf32>
    %259 = vector.extract_strided_slice %20 {offsets = [48, 0], sizes = [16, 32], strides = [1, 1]} : vector<64x128xf32> to vector<16x32xf32>
    %260 = vector.extract_strided_slice %258 {offsets = [0, 0], sizes = [1, 32], strides = [1, 1]} : vector<3x32xf32> to vector<1x32xf32>
    %261 = vector.broadcast %260 : vector<1x32xf32> to vector<16x32xf32>
    %262 = arith.mulf %259, %261 : vector<16x32xf32>
    %263 = vector.extract_strided_slice %20 {offsets = [48, 32], sizes = [16, 32], strides = [1, 1]} : vector<64x128xf32> to vector<16x32xf32>
    %264 = vector.extract_strided_slice %258 {offsets = [1, 0], sizes = [1, 32], strides = [1, 1]} : vector<3x32xf32> to vector<1x32xf32>
    %265 = vector.broadcast %264 : vector<1x32xf32> to vector<16x32xf32>
    %266 = arith.mulf %263, %265 : vector<16x32xf32>
    %267 = arith.addf %262, %266 : vector<16x32xf32>
    %268 = vector.extract_strided_slice %20 {offsets = [48, 64], sizes = [16, 32], strides = [1, 1]} : vector<64x128xf32> to vector<16x32xf32>
    %269 = vector.extract_strided_slice %258 {offsets = [2, 0], sizes = [1, 32], strides = [1, 1]} : vector<3x32xf32> to vector<1x32xf32>
    %270 = vector.broadcast %269 : vector<1x32xf32> to vector<16x32xf32>
    %271 = arith.mulf %268, %270 : vector<16x32xf32>
    %272 = arith.addf %267, %271 : vector<16x32xf32>
    %cst_70 = arith.constant 0.333333343 : f32
    %273 = vector.broadcast %cst_70 : f32 to vector<16x32xf32>
    %274 = arith.mulf %272, %273 : vector<16x32xf32>
    %c3 = arith.constant 3 : index
    %c0_71 = arith.constant 0 : index
    %c0_72 = arith.constant 0 : index
    %275 = vector.load %arg12[%c3, %c0_71, %c0_72] : memref<4x16x32xf32, #tpu.memory_space<vmem>>, vector<1x16x32xf32>
    %276 = vector.shape_cast %275 : vector<1x16x32xf32> to vector<16x32xf32>
    %277 = vector.shape_cast %274 : vector<16x32xf32> to vector<1x16x32xf32>
    tpu.vector_store %arg12[%c3, %c0_71, %c0_72], %277 {strides = array<i32>} : memref<4x16x32xf32, #tpu.memory_space<vmem>>, vector<1x16x32xf32>,
    return
  }
  func.func @transform_0(%arg0: i32) -> (i32, i32, i32) {
    %c0_i32 = arith.constant 0 : i32
    %c0_i32_0 = arith.constant 0 : i32
    %c0_i32_1 = arith.constant 0 : i32
    return %arg0, %c0_i32, %c0_i32_0 : i32, i32, i32
  }
  func.func @transform_1(%arg0: i32) -> (i32, i32) {
    %c0_i32 = arith.constant 0 : i32
    %c0_i32_0 = arith.constant 0 : i32
    %c0_i32_1 = arith.constant 0 : i32
    return %c0_i32, %c0_i32_0 : i32, i32
  }
  func.func @transform_2(%arg0: i32) -> (i32, i32) {
    %c0_i32 = arith.constant 0 : i32
    %c0_i32_0 = arith.constant 0 : i32
    %c0_i32_1 = arith.constant 0 : i32
    return %c0_i32, %c0_i32_0 : i32, i32
  }
  func.func @transform_3(%arg0: i32) -> (i32, i32) {
    %c0_i32 = arith.constant 0 : i32
    %c0_i32_0 = arith.constant 0 : i32
    %c0_i32_1 = arith.constant 0 : i32
    return %c0_i32, %c0_i32_0 : i32, i32
  }
  func.func @transform_4(%arg0: i32) -> (i32, i32) {
    %c0_i32 = arith.constant 0 : i32
    %c0_i32_0 = arith.constant 0 : i32
    %c0_i32_1 = arith.constant 0 : i32
    return %c0_i32, %c0_i32_0 : i32, i32
  }
  func.func @transform_5(%arg0: i32) -> (i32, i32) {
    %c0_i32 = arith.constant 0 : i32
    %c0_i32_0 = arith.constant 0 : i32
    %c0_i32_1 = arith.constant 0 : i32
    return %c0_i32, %c0_i32_0 : i32, i32
  }
  func.func @transform_6(%arg0: i32) -> (i32, i32) {
    %c0_i32 = arith.constant 0 : i32
    %c0_i32_0 = arith.constant 0 : i32
    %c0_i32_1 = arith.constant 0 : i32
    return %c0_i32, %c0_i32_0 : i32, i32
  }
  func.func @transform_7(%arg0: i32) -> (i32, i32) {
    %c0_i32 = arith.constant 0 : i32
    %c0_i32_0 = arith.constant 0 : i32
    %c0_i32_1 = arith.constant 0 : i32
    return %c0_i32, %c0_i32_0 : i32, i32
  }
  func.func @transform_8(%arg0: i32) -> (i32, i32) {
    %c0_i32 = arith.constant 0 : i32
    %c0_i32_0 = arith.constant 0 : i32
    %c0_i32_1 = arith.constant 0 : i32
    return %c0_i32, %c0_i32_0 : i32, i32
  }
  func.func @transform_9(%arg0: i32) -> (i32, i32) {
    %c0_i32 = arith.constant 0 : i32
    %c0_i32_0 = arith.constant 0 : i32
    %c0_i32_1 = arith.constant 0 : i32
    return %c0_i32, %c0_i32_0 : i32, i32
  }
  func.func @transform_10(%arg0: i32) -> (i32, i32) {
    %c0_i32 = arith.constant 0 : i32
    %c0_i32_0 = arith.constant 0 : i32
    %c0_i32_1 = arith.constant 0 : i32
    return %c0_i32, %c0_i32_0 : i32, i32
  }
  func.func @transform_11(%arg0: i32) -> (i32, i32, i32) {
    %c0_i32 = arith.constant 0 : i32
    %c0_i32_0 = arith.constant 0 : i32
    %c0_i32_1 = arith.constant 0 : i32
    return %arg0, %c0_i32, %c0_i32_0 : i32, i32, i32
  }
}

</mosaic_0001>

<bundles_post_ra>
// kernel: multi_conv_layer.1
= control target key start
LH: loop header
LB: loop body
LE: loop exit
PB: predicated region body
PF: predicated region fallthrough
CT: control target
= control target key end

     0   :  { %16 = vsyncpa [#allocation3], 0  ;;  %s3568_s0 = inlined_call_operand.vmem [shape: f32[8,16,32], index: 0, kind: input, shape index: {}]   ;;  %s3569_s1 = inlined_call_operand.vmem [shape: bf16[160,128], index: 1, kind: input, shape index: {}]   ;;  %s3570_s2 = inlined_call_operand.vmem [shape: f32[1,128], index: 2, kind: input, shape index: {}]   ;;  %s3571_s3 = inlined_call_operand.vmem [shape: bf16[32,32], index: 3, kind: input, shape index: {}]   ;;  %s3572_s4 = inlined_call_operand.vmem [shape: f32[1,32], index: 4, kind: input, shape index: {}]   ;;  %s3573_s5 = inlined_call_operand.vmem [shape: bf16[32,32], index: 5, kind: input, shape index: {}]   ;;  %s3574_s6 = inlined_call_operand.vmem [shape: f32[1,32], index: 6, kind: input, shape index: {}]   ;;  %s3575_s7 = inlined_call_operand.vmem [shape: f32[3,32], index: 7, kind: input, shape index: {}]   ;;  %s3576_s8 = inlined_call_operand.vmem [shape: f32[3,1], index: 8, kind: input, shape index: {}]   ;;  %s3577_s9 = inlined_call_operand.vmem [shape: f32[16,32], index: 9, kind: input, shape index: {}]   ;;  %s3578_s10 = inlined_call_operand.vmem [shape: f32[3,32], index: 10, kind: input, shape index: {}]   ;;  %s3579_s11 = inlined_call_operand.hbm [shape: f32[8,16,32], index: 11, kind: output, shape index: {}]  }
   0x1   :  { %18 = vsyncpa [#allocation3 + $0x1], 0  ;;  %s2942_s17 = smov 0   ;;  %s2944_s18 = smov 0  }
   0x2   :  { %s2946_s19 = smov 0   ;;  %s2948_s20 = smov 0  }
   0x3 LB: > { %s2963_s21 = sadd.s32 4294967295, %s2870_s20   ;;  %s2273_s22 = sadd.s32 4294967294, %s2870_s20   ;;  %s2870_s20 = sphi %s2948_s20, %s3587_s20   ;;  %s2866_s19 = sphi %s2946_s19, %s3586_s19   ;;  %s2862_s18 = sphi %s2944_s18, %s3585_s18   ;;  %s2858_s17 = sphi %s2942_s17, %s3584_s17  }
   0x4   : > { %s2967_s23 = sadd.s32 1, %s2870_s20   ;;  %s267_s24 = sadd.s32 1, %s2866_s19 }
   0x5   : > { %s264_s25 = ssub.s32 %s2870_s20, %s2967_s23  ;;  %p277_p0 = scmp.ne.s32.totalorder %s2866_s19, %s2862_s18 }
   0x6   : > { %p265_p1 = scmp.eq.s32.totalorder %s264_s25, 0  ;;  %p278_p2 = scmp.eq.s32.totalorder %s2963_s21, 1 }
   0x7   : > { %p283_p3 = scmp.ne.s32.totalorder %s2862_s18, %s2858_s17  ;;  %p284_p4 = scmp.eq.s32.totalorder %s2273_s22, 1 }
   0x8   : > { %s2978_s26 = scalar_select %p265_p1, %s2866_s19, %s267_s24  }
   0x9   : > { %p2980_p5 = por %p278_p2, %p277_p0  ;;  %p2984_p6 = por %p284_p4, %p283_p3 }
   0xa   : > { %p2276_p7 = scmp.ge.s32.totalorder %s2870_s20, 1  ;;  %p342_p8 = scmp.lt.s32.totalorder %s2870_s20, 3 }
   0xc   : > { %p343_p9 = pnand %p2276_p7, %p342_p8 }
   0xd   : > { %s2278_s29 = sshll.u32 (!%p343_p9), %s2963_s21, 2  ;;  %v2650_v0 = vld [vmem:[%s3569_s1] sm:$0xff] (!%p343_p9)   ;;  %v2872_v1 = vmov (!%p343_p9), 0   ;;  %v2651_v2 = vld [vmem:[%s3569_s1 + $0x8] sm:$0xff] (!%p343_p9)   ;;  %vm433_vm0 = vcmask (!%p343_p9), 1040384   ;;  %v2652_v3 = vld [vmem:[%s3569_s1 + $0x10] sm:$0xff] (!%p343_p9)  }
   0xe   : > { %346 = sbr.rel (%p343_p9) target bundleno = 2919 (0xb67), region = 64  ;;  %p384_p10 = scmp.lt.s32.totalorder (!%p343_p9), %s2278_s29, 7  ;;  %714 = vmatprep.subr.bf16.mxu0 (!%p343_p9), %v2872_v1  ;;  %vm454_vm1 = vcmask (!%p343_p9), 1046528   ;;  %vm408_vm2 = vcmask (!%p343_p9), 1041408   ;;  %v2653_v12 = vld [vmem:[%s3569_s1 + $0x18] sm:$0xff] (!%p343_p9)   ;;  %v2654_v37 = vld [vmem:[%s3569_s1 + $0x20] sm:$0xff] (!%p343_p9)  }
   0xf   : > { %715 = vmatpush1.bf16.msra.mxu0 (!%p343_p9), %v2650_v0  ;;  %s2873_s13 = smov (!%p343_p9), 32   ;;  %s2874_s14 = smov (!%p343_p9), 96   ;;  %vm475_vm3 = vcmask (!%p343_p9), 1045504   ;;  %v2655_v47 = vld [vmem:[%s3569_s1 + $0x28] sm:$0xff] (!%p343_p9)   ;;  %vm580_vm4 = vcmask (!%p343_p9), 261120   ;;  %v2660_v56 = vld [vmem:[%s3571_s3] sm:$0xff] (!%p343_p9)  }
  0x10   : > { %716 = vmatprep.subr.bf16.mxu0 (!%p343_p9), %v2872_v1  ;;  %s2875_s22 = smov (!%p343_p9), 64   ;;  %v2656_v61 = vld [vmem:[%s3569_s1 + $0x30] sm:$0xff] (!%p343_p9)   ;;  %2417 = vmatprep.subr.bf16.mxu1 (!%p343_p9), %v2660_v56  ;;  %vm589_vm5 = vcmask (!%p343_p9), 523264   ;;  %vm598_vm6 = vcmask (!%p343_p9), 785408   ;;  %vm1062_vm7 = vcmask (!%p343_p9), 130048   ;;  %vm2877_vm8 = vmmov (!%p343_p9), 0   ;;  %vm3330_vm9 = vmpackc.low (!%p343_p9), %vm580_vm4, %vm580_vm4 }
  0x11   : > { %2418 = vmatpush3.bf16.msra.mxu1 (!%p343_p9), %v2660_v56  ;;  %s2372_s16 = sshll.u32 (!%p343_p9), %s2963_s21, 10 }
  0x13   : > { %717 = vmatpush1.bf16.msra.mxu0 (!%p343_p9), %v2651_v2 }
  0x14   : > { %718 = vmatprep.subr.bf16.mxu0 (!%p343_p9), %v2872_v1 }
  0x15   : > { %s3589_s29 = smov (!%p384_p10, %s2278_s29), 7 }
  0x16   : > { %s2370_s15 = sshll.u32 %s3589_s29, 4  ;;  %s3517_s29 = scalar_lea.hbm %s3579_s11, %s2372_s16 }
  0x17   : > { %s3002_s24 = scalar_lea.vmem %s3568_s0, %s2370_s15  ;;  %719 = vmatpush1.bf16.msra.mxu0 %v2652_v3  ;;  %s2879_s15 = smov [#allocation2]  }
  0x18   : > { %v3008_v4 = vld [vmem:[%s3002_s24] sm:$0xff]  ;;  %v3011_v5 = vld [vmem:[%s3002_s24 + $0x8] sm:$0xff]  ;;  %v3014_v6 = vld [vmem:[%s3002_s24 + $0x10] sm:$0xff]  ;;  %720 = vmatprep.subr.bf16.mxu0 %v2872_v1 }
  0x19   : > { %v434_v7 = vrot.slane %v3008_v4, 7  ;;  %v435_v8 = vrot.slane %v3011_v5, 7  ;;  %v455_v9 = vrot.slane %v3008_v4, 1  ;;  %v456_v10 = vrot.slane %v3011_v5, 1  ;;  %v3022_v11 = vld [vmem:[%s3002_s24 + $0x18] sm:$0xff]  ;;  %v3034_v19 = vld [vmem:[%s3002_s24 + $0x20] sm:$0xff] }
  0x1a   : > { %v437_v13 = vrot.slane %v3014_v6, 7  ;;  %v438_v14 = vrot.slane %v3022_v11, 7  ;;  %v3037_v20 = vld [vmem:[%s3002_s24 + $0x28] sm:$0xff]  ;;  %v3043_v25 = vld [vmem:[%s3002_s24 + $0x30] sm:$0xff]  ;;  %v2594_v26 = vpack.i.bf16 %v3011_v5, %v3008_v4  ;;  %v458_v27 = vrot.slane %v3014_v6, 1  ;;  %v3051_v30 = vld [vmem:[%s3002_s24 + $0x38] sm:$0xff] }
  0x1b   : > { %v436_v15 = vsel %vm433_vm0, %v434_v7, %v435_v8  ;;  %v450_v16 = vsel %vm433_vm0, 0.0, %v434_v7  ;;  %v457_v17 = vsel %vm454_vm1, %v455_v9, %v456_v10  ;;  %v471_v18 = vsel %vm454_vm1, %v456_v10, 0.0  ;;  %721 = vmatpush1.bf16.msra.mxu0 %v2653_v12  ;;  %v2657_v10 = vld [vmem:[%s3569_s1 + $0x38] sm:$0xff]  }
  0x1c   : > { %v2589_v21 = vpack.i.bf16 %v436_v15, %v450_v16  ;;  %v2604_v22 = vpack.i.bf16 %v471_v18, %v457_v17  ;;  %v439_v23 = vsel %vm433_vm0, %v437_v13, %v438_v14  ;;  %v451_v24 = vsel %vm433_vm0, 0.0, %v437_v13  ;;  %722 = vmatprep.subr.bf16.mxu0 %v2872_v1  ;;  %v2658_v17 = vld [vmem:[%s3569_s1 + $0x40] sm:$0xff]   ;;  %v2659_v18 = vld [vmem:[%s3569_s1 + $0x48] sm:$0xff]  }
  0x1d   : > { %v459_v28 = vrot.slane %v3022_v11, 1  ;;  %v440_v29 = vrot.slane %v3034_v19, 7  ;;  %v2609_v31 = vpack.i.bf16 %v439_v23, %v451_v24  ;;  %v441_v32 = vrot.slane %v3037_v20, 7 }
  0x1e   : > { %2590 = vrot.lane.b32.xlu0 %v2589_v21, %s2873_s13  ;;  %2605 = vrot.lane.b32.xlu1 %v2604_v22, %s2874_s14  ;;  %v410_v33 = vrot.slane %v3011_v5, 6  ;;  %v409_v34 = vrot.slane %v3008_v4, 6  ;;  %v443_v38 = vrot.slane %v3043_v25, 7  ;;  %v444_v39 = vrot.slane %v3051_v30, 7  ;;  %v2661_v21 = vld [vmem:[%s3571_s3 + $0x8] sm:$0xff]  }
  0x1f   : > { %v460_v35 = vsel %vm454_vm1, %v458_v27, %v459_v28  ;;  %v472_v36 = vsel %vm454_vm1, %v459_v28, 0.0  ;;  %v2599_v41 = vpack.i.bf16 %v3022_v11, %v3014_v6  ;;  %v452_v42 = vsel %vm433_vm0, 0.0, %v440_v29  ;;  %723 = vmatpush1.bf16.msra.mxu0 %v2654_v37  ;;  %2419 = vmatprep.subr.bf16.mxu1 %v2661_v21 }
  0x20   : > { %v3069_v40 = vsel %vm408_vm2, %v409_v34, %v410_v33  ;;  %v2614_v43 = vpack.i.bf16 %v472_v36, %v460_v35  ;;  %v442_v44 = vsel %vm433_vm0, %v440_v29, %v441_v32  ;;  %v412_v45 = vrot.slane %v3014_v6, 6  ;;  %724 = vmatprep.subr.bf16.mxu0 %v2872_v1  ;;  %2420 = vmatpush3.bf16.msra.mxu1 %v2661_v21 }
  0x21   : > { %v413_v46 = vrot.slane %v3022_v11, 6  ;;  %v445_v48 = vsel %vm433_vm0, %v443_v38, %v444_v39  ;;  %v453_v49 = vsel %vm433_vm0, 0.0, %v443_v38  ;;  %v476_v50 = vrot.slane %v3008_v4, 2 }
  0x22   : > { %2595 = vrot.lane.b32.xlu0 %v2594_v26, %s2875_s22  ;;  %2610 = vrot.lane.b32.xlu1 %v2609_v31, %s2873_s13  ;;  %v477_v51 = vrot.slane %v3011_v5, 2  ;;  %v2619_v53 = vpack.i.bf16 %v442_v44, %v452_v42  ;;  %v2624_v57 = vpack.i.bf16 %v445_v48, %v453_v49  ;;  %v461_v58 = vrot.slane %v3034_v19, 1 }
  0x23   : > { %v3090_v52 = vsel %vm408_vm2, %v412_v45, %v413_v46  ;;  %v462_v59 = vrot.slane %v3037_v20, 1  ;;  %725 = vmatpush1.bf16.msra.mxu0 %v2655_v47  ;;  %v464_v62 = vrot.slane %v3043_v25, 1  ;;  %v465_v63 = vrot.slane %v3051_v30, 1 }
  0x24   : > { %v478_v54 = vsel %vm475_vm3, %v476_v50, %v477_v51  ;;  %v496_v55 = vsel %vm475_vm3, %v477_v51, 0.0  ;;  %v479_v0 = vrot.slane %v3014_v6, 2  ;;  %v480_v2 = vrot.slane %v3022_v11, 2  ;;  %726 = vmatprep.subr.bf16.mxu0 %v2872_v1 }
  0x25   : > { %v608_v60 = vpack.c.bf16 %v496_v55, %v478_v54  ;;  %v2629_v7 = vpack.i.bf16 %v3037_v20, %v3034_v19  ;;  %v2634_v8 = vpack.i.bf16 %v3051_v30, %v3043_v25  ;;  %v463_v11 = vsel %vm454_vm1, %v461_v58, %v462_v59 }
  0x26   : > { %2600 = vrot.lane.b32.xlu0 %v2599_v41, %s2875_s22  ;;  %2615 = vrot.lane.b32.xlu1 %v2614_v43, %s2874_s14  ;;  %v3111_v3 = vsel %vm475_vm3, %v479_v0, %v480_v2  ;;  %v3114_v5 = vsel %vm475_vm3, %v480_v2, 0.0  ;;  %v473_v12 = vsel %vm454_vm1, %v462_v59, 0.0  ;;  %v466_v13 = vsel %vm454_vm1, %v464_v62, %v465_v63 }
  0x27   : > { %2292 = vmatprep.mubr.msk.bf16.mxu0 %vm580_vm4, %v608_v60  ;;  %v610_v9 = vpack.c.bf16 %v3114_v5, %v3111_v3  ;;  %727 = vmatpush1.bf16.msra.mxu0 %v2656_v61  ;;  %v474_v14 = vsel %vm454_vm1, %v465_v63, 0.0  ;;  %v2639_v15 = vpack.i.bf16 %v473_v12, %v463_v11  ;;  %v429_v27 = vsel %vm408_vm2, 0.0, %v409_v34 }
  0x28   : > { %728 = vmatprep.subr.bf16.mxu0 %v2872_v1  ;;  %v2644_v16 = vpack.i.bf16 %v474_v14, %v466_v13  ;;  %v430_v28 = vsel %vm408_vm2, 0.0, %v412_v45  ;;  %v415_v35 = vrot.slane %v3034_v19, 6  ;;  %v416_v36 = vrot.slane %v3037_v20, 6 }
  0x29   : > { %v418_v41 = vrot.slane %v3043_v25, 6  ;;  %v419_v42 = vrot.slane %v3051_v30, 6  ;;  %v482_v45 = vrot.slane %v3034_v19, 2  ;;  %v483_v46 = vrot.slane %v3037_v20, 2 }
  0x2a   : > { %2620 = vrot.lane.b32.xlu0 %v2619_v53, %s2873_s13  ;;  %2625 = vrot.lane.b32.xlu1 %v2624_v57, %s2873_s13  ;;  %v417_v19 = vsel %vm408_vm2, %v415_v35, %v416_v36  ;;  %v431_v20 = vsel %vm408_vm2, 0.0, %v415_v35 }
  0x2b   : > { %729 = vmatpush1.bf16.msra.mxu0 %v2657_v10  ;;  %v420_v59 = vsel %vm408_vm2, %v418_v41, %v419_v42  ;;  %v432_v60 = vsel %vm408_vm2, 0.0, %v418_v41  ;;  %v484_v2 = vsel %vm475_vm3, %v482_v45, %v483_v46 }
  0x2c   : > { %730 = vmatprep.subr.bf16.mxu0 %v2872_v1 }
  0x2e   : > { %2630 = vrot.lane.b32.xlu0 %v2629_v7, %s2875_s22  ;;  %2635 = vrot.lane.b32.xlu1 %v2634_v8, %s2875_s22  ;;  %v498_v7 = vsel %vm475_vm3, %v483_v46, 0.0 }
  0x2f   : > { %731 = vmatpush1.bf16.msra.mxu0 %v2658_v17  ;;  %v612_v14 = vpack.c.bf16 %v498_v7, %v484_v2 }
  0x30   : > { %732 = vmatprep.subr.bf16.mxu0 %v2872_v1 }
  0x32   : > { %2640 = vrot.lane.b32.xlu0 %v2639_v15, %s2874_s14  ;;  %2645 = vrot.lane.b32.xlu1 %v2644_v16, %s2874_s14 }
  0x33   : > { %733 = vmatpush1.bf16.msra.mxu0 %v2659_v18 }
  0x90   : > { %v2591_v22 = vpop.permute.xlu0 %2590  ;;  %v2606_v23 = vpop.permute.xlu1 %2605 }
  0x91   : > { %v2593_v24 = vunpack.i.h.bf16 %v2591_v22  ;;  %v2592_v26 = vunpack.i.l.bf16 %v2591_v22  ;;  %v2608_v29 = vunpack.i.h.bf16 %v2606_v23  ;;  %v2607_v31 = vunpack.i.l.bf16 %v2606_v23 }
  0x93   : > { %v581_v34 = vsel %vm580_vm4, %v429_v27, %v2592_v26  ;;  %v582_v6 = vsel %vm580_vm4, %v3069_v40, %v2593_v24  ;;  %v485_v24 = vrot.slane %v3043_v25, 2  ;;  %v486_v26 = vrot.slane %v3051_v30, 2 }
  0x94   : > { %v2596_v32 = vpop.permute.xlu0 %2595  ;;  %v2611_v33 = vpop.permute.xlu1 %2610 }
  0x95   : > { %v2598_v37 = vunpack.i.h.bf16 %v2596_v32  ;;  %v2597_v38 = vunpack.i.l.bf16 %v2596_v32  ;;  %v2613_v39 = vunpack.i.h.bf16 %v2611_v33  ;;  %v2612_v4 = vunpack.i.l.bf16 %v2611_v33 }
  0x96   : > { %v487_v25 = vsel %vm475_vm3, %v485_v24, %v486_v26  ;;  %v499_v30 = vsel %vm475_vm3, %v486_v26, 0.0  ;;  %v3257_v24 = vld [vmem:[%s3577_s9 + $0x8] sm:$0xff] }
  0x97   : > { %v590_v43 = vsel %vm589_vm5, %v581_v34, %v2597_v38  ;;  %v591_v44 = vsel %vm589_vm5, %v582_v6, %v2598_v37  ;;  %v584_v47 = vsel %vm580_vm4, %v3090_v52, %v2613_v39  ;;  %v583_v48 = vsel %vm580_vm4, %v430_v28, %v2612_v4 }
  0x98   : > { %v2601_v49 = vpop.permute.xlu0 %2600  ;;  %v2616_v50 = vpop.permute.xlu1 %2615  ;;  %v599_v40 = vsel %vm598_vm6, %v590_v43, %v2607_v31  ;;  %v600_v51 = vsel %vm598_vm6, %v591_v44, %v2608_v29  ;;  %v614_v43 = vpack.c.bf16 %v499_v30, %v487_v25 }
  0x99   : > { %v2603_v53 = vunpack.i.h.bf16 %v2601_v49  ;;  %v2602_v54 = vunpack.i.l.bf16 %v2601_v49  ;;  %v2618_v55 = vunpack.i.h.bf16 %v2616_v50  ;;  %v2617_v56 = vunpack.i.l.bf16 %v2616_v50  ;;  %v2663_v49 = vld [vmem:[%s3573_s5 + $0x8] sm:$0xff]   ;;  %v2281_v50 = vld [vmem:[%s3570_s2] ss:$0 sm:$0xff] }
  0x9a   : > { %v607_v57 = vpack.c.bf16 %v600_v51, %v599_v40 }
  0x9b   : > { %v593_v58 = vsel %vm589_vm5, %v584_v47, %v2603_v53  ;;  %v592_v52 = vsel %vm589_vm5, %v583_v48, %v2602_v54  ;;  %v2662_v48 = vld [vmem:[%s3573_s5] sm:$0xff]  }
  0x9c   : > { %794 = vrot.lane.b32.xlu0 %v607_v57, %s2875_s22  ;;  %747 = vmatmul.mubr.bf16.vlgmr.msra.gmra.mrb[0].mxu0 %v607_v57  ;;  %v601_v61 = vsel %vm598_vm6, %v592_v52, %v2617_v56  ;;  %v602_v62 = vsel %vm598_vm6, %v593_v58, %v2618_v55  ;;  %v2621_v63 = vpop.permute.xlu0 %2620  ;;  %v2626_v0 = vpop.permute.xlu1 %2625 }
  0x9d   : > { %v609_v8 = vpack.c.bf16 %v602_v62, %v601_v61  ;;  %2293 = vmatprep.mubr.msk.bf16.mxu0 %vm580_vm4, %v610_v9  ;;  %v2623_v10 = vunpack.i.h.bf16 %v2621_v63  ;;  %v2622_v11 = vunpack.i.l.bf16 %v2621_v63  ;;  %v2628_v12 = vunpack.i.h.bf16 %v2626_v0  ;;  %2429 = vmatprep.subr.bf16.mxu1 %v2662_v48 }
  0x9e   : > { %v2627_v13 = vunpack.i.l.bf16 %v2626_v0 }
  0x9f   : > { %796 = vrot.lane.b32.xlu1 %v609_v8, %s2875_s22  ;;  %v586_v15 = vsel %vm580_vm4, %v417_v19, %v2623_v10  ;;  %v585_v16 = vsel %vm580_vm4, %v431_v20, %v2622_v11  ;;  %v588_v17 = vsel %vm580_vm4, %v420_v59, %v2628_v12 }
  0xa0   : > { %v587_v18 = vsel %vm580_vm4, %v432_v60, %v2627_v13  ;;  %v2631_v21 = vpop.permute.xlu0 %2630  ;;  %v2636_v22 = vpop.permute.xlu1 %2635 }
  0xa1   : > { %v2633_v3 = vunpack.i.h.bf16 %v2631_v21  ;;  %v2632_v5 = vunpack.i.l.bf16 %v2631_v21  ;;  %v2638_v9 = vunpack.i.h.bf16 %v2636_v22  ;;  %v2637_v23 = vunpack.i.l.bf16 %v2636_v22  ;;  %v3252_v22 = vld [vmem:[%s3577_s9] sm:$0xff] }
  0xa3   : > { %v594_v27 = vsel %vm589_vm5, %v585_v16, %v2632_v5  ;;  %v595_v28 = vsel %vm589_vm5, %v586_v15, %v2633_v3  ;;  %v596_v29 = vsel %vm589_vm5, %v587_v18, %v2637_v23  ;;  %v597_v31 = vsel %vm589_vm5, %v588_v17, %v2638_v9  ;;  %v2296_v18 = vld [vmem:[%s3572_s4] ss:$0 sm:$0xff] }
  0xa4   : > { %755 = vmatmul.mubr.bf16.gmra.mrb[4].mxu0 %v609_v8  ;;  %v2641_v32 = vpop.permute.xlu0 %2640  ;;  %v2646_v33 = vpop.permute.xlu1 %2645 }
  0xa5   : > { %v2643_v35 = vunpack.i.h.bf16 %v2641_v32  ;;  %v2642_v36 = vunpack.i.l.bf16 %v2641_v32  ;;  %v2648_v37 = vunpack.i.h.bf16 %v2646_v33  ;;  %v2647_v38 = vunpack.i.l.bf16 %v2646_v33  ;;  %2294 = vmatprep.mubr.msk.bf16.mxu0 %vm580_vm4, %v612_v14 }
  0xa7   : > { %v603_v39 = vsel %vm598_vm6, %v594_v27, %v2642_v36  ;;  %v604_v4 = vsel %vm598_vm6, %v595_v28, %v2643_v35  ;;  %v605_v34 = vsel %vm598_vm6, %v596_v29, %v2647_v38  ;;  %v606_v6 = vsel %vm598_vm6, %v597_v31, %v2648_v37 }
  0xa8   : > { %v611_v41 = vpack.c.bf16 %v604_v4, %v603_v39  ;;  %v613_v42 = vpack.c.bf16 %v606_v6, %v605_v34 }
  0xaa   : > { %798 = vrot.lane.b32.xlu0 %v611_v41, %s2875_s22  ;;  %800 = vrot.lane.b32.xlu1 %v613_v42, %s2875_s22 }
  0xac   : > { %763 = vmatmul.mubr.bf16.gmra.mrb[8].mxu0 %v611_v41 }
  0xad   : > { %2295 = vmatprep.mubr.msk.bf16.mxu0 %vm580_vm4, %v614_v43 }
  0xb4   : > { %771 = vmatmul.mubr.bf16.gmra.mrb[12].mxu0 %v613_v42 }
 0x10e   : > { %v795_v44 = vpop.permute.xlu0 %794 }
 0x10f   : > { %2421 = vmatprep.mubr.msk.bf16.mxu1 %vm580_vm4, %v795_v44 }
 0x111   : > { %v797_v45 = vpop.permute.xlu1 %796 }
 0x112   : > { %2422 = vmatmul.mubr.msk.bf16.vlgmr.msra.gmra.mrb[0].mxu1 %vm580_vm4, %v797_v45 }
 0x113   : > { %2430 = vmatpush3.bf16.msra.mxu1 %v2662_v48 }
 0x114   : > { %2431 = vmatprep.subr.bf16.mxu1 %v2663_v49 }
 0x117   : > { %2432 = vmatpush3.bf16.msra.mxu1 %v2663_v49 }
 0x11c   : > { %v799_v46 = vpop.permute.xlu0 %798  ;;  %v801_v47 = vpop.permute.xlu1 %800 }
 0x11d   : > { %2425 = vmatprep.mubr.msk.bf16.mxu1 %vm580_vm4, %v799_v46 }
 0x11e   : > { %2426 = vmatmul.mubr.msk.bf16.gmra.mrb[4].mxu1 %vm580_vm4, %v801_v47 }
 0x16f   : > { %v748_v40 = vpop.f32.mrb[0].mxu0 }
 0x170   : > { %v750_v51 = vpop.f32.mrb[1].mxu0  ;;  %v3218_v54 = vadd.f32 %v2281_v50, %v748_v40 }
 0x171   : > { %v751_v53 = vpop.f32.mrb[2].mxu0 }
 0x172   : > { %v3220_v55 = vadd.f32 %v2281_v50, %v751_v53  ;;  %v753_v56 = vpop.f32.mrb[3].mxu0 }
 0x174   : > { %v891_v57 = vpack.c.bf16 %v3220_v55, %v3218_v54 }
 0x176   : > { %910 = vrot.lane.b32.xlu0 %v891_v57, %s2873_s13 }
 0x177   : > { %v756_v19 = vpop.f32.mrb[4].mxu0 }
 0x178   : > { %v758_v20 = vpop.f32.mrb[5].mxu0  ;;  %v3225_v52 = vadd.f32 %v2281_v50, %v756_v19 }
 0x179   : > { %v759_v58 = vpop.f32.mrb[6].mxu0 }
 0x17a   : > { %v3227_v59 = vadd.f32 %v2281_v50, %v759_v58  ;;  %v761_v60 = vpop.f32.mrb[7].mxu0 }
 0x17c   : > { %v892_v61 = vpack.c.bf16 %v3227_v59, %v3225_v52 }
 0x17e   : > { %912 = vrot.lane.b32.xlu1 %v892_v61, %s2873_s13 }
 0x17f   : > { %v764_v62 = vpop.f32.mrb[8].mxu0 }
 0x180   : > { %v3232_v63 = vadd.f32 %v2281_v50, %v764_v62  ;;  %v766_v0 = vpop.f32.mrb[9].mxu0 }
 0x181   : > { %v767_v2 = vpop.f32.mrb[10].mxu0 }
 0x182   : > { %v3234_v7 = vadd.f32 %v2281_v50, %v767_v2  ;;  %v769_v8 = vpop.f32.mrb[11].mxu0 }
 0x184   : > { %v893_v10 = vpack.c.bf16 %v3234_v7, %v3232_v63 }
 0x186   : > { %914 = vrot.lane.b32.xlu0 %v893_v10, %s2873_s13 }
 0x187   : > { %v772_v11 = vpop.f32.mrb[12].mxu0 }
 0x188   : > { %v3239_v12 = vadd.f32 %v2281_v50, %v772_v11  ;;  %v774_v13 = vpop.f32.mrb[13].mxu0 }
 0x189   : > { %v775_v14 = vpop.f32.mrb[14].mxu0 }
 0x18a   : > { %v3241_v15 = vadd.f32 %v2281_v50, %v775_v14  ;;  %v777_v16 = vpop.f32.mrb[15].mxu0 }
 0x18c   : > { %v894_v17 = vpack.c.bf16 %v3241_v15, %v3239_v12 }
 0x18e   : > { %916 = vrot.lane.b32.xlu1 %v894_v17, %s2873_s13 }
 0x1e5   : > { %v2423_v21 = vpop.f32.mrb[0].mxu1 }
 0x1e6   : > { %v869_v3 = vadd.f32 %v2423_v21, %v2296_v18  ;;  %v860_v5 = vpop.f32.mrb[1].mxu1 }
 0x1e7   : > { %v861_v9 = vadd.f32 %v2296_v18, %v860_v5  ;;  %v2424_v23 = vpop.f32.mrb[2].mxu1 }
 0x1e8   : > { %v1314_v26 = vadd.f32 %v3252_v22, %v869_v3  ;;  %v872_v27 = vadd.f32 %v2424_v23, %v2296_v18  ;;  %v911_v28 = vpop.permute.xlu0 %910  ;;  %v863_v29 = vpop.f32.mrb[3].mxu1 }
 0x1e9   : > { %v1012_v31 = vadd.f32 %v3252_v22, %v861_v9  ;;  %v864_v32 = vadd.f32 %v2296_v18, %v863_v29  ;;  %2433 = vmatprep.mubr.msk.bf16.mxu1 %vm580_vm4, %v911_v28 }
 0x1ea   : > { %v2322_v33 = vmul.f32 -1.442695, %v1314_v26  ;;  %v1315_v35 = vadd.f32 %v3257_v24, %v872_v27 }
 0x1eb   : > { %v2310_v36 = vmul.f32 -1.442695, %v1012_v31  ;;  %v1013_v37 = vadd.f32 %v3257_v24, %v864_v32 }
 0x1ec   : > { %2664 = vpow2.f32 %v2322_v33  ;;  %v2323_v38 = vmul.f32 -1.442695, %v1315_v35 }
 0x1ed   : > { %2666 = vpow2.f32 %v2310_v36  ;;  %v2311_v25 = vmul.f32 -1.442695, %v1013_v37 }
 0x1ee   : > { %2668 = vpow2.f32 %v2323_v38 }
 0x1ef   : > { %2670 = vpow2.f32 %v2311_v25 }
 0x1f0   : > { %v913_v30 = vpop.permute.xlu1 %912 }
 0x1f1   : > { %2434 = vmatmul.mubr.msk.bf16.vlgmr.msra.gmra.mrb[8].mxu1 %vm580_vm4, %v913_v30  ;;  %v2427_v39 = vpop.f32.mrb[4].mxu1 }
 0x1f2   : > { %v885_v4 = vadd.f32 %v2427_v39, %v2296_v18  ;;  %v876_v34 = vpop.f32.mrb[5].mxu1 }
 0x1f3   : > { %v877_v6 = vadd.f32 %v2296_v18, %v876_v34  ;;  %v2428_v41 = vpop.f32.mrb[6].mxu1  ;;  %v2303_v34 = vld [vmem:[%s3574_s6] ss:$0 sm:$0xff] }
 0x1f4   : > { %v888_v42 = vadd.f32 %v2428_v41, %v2296_v18  ;;  %v879_v43 = vpop.f32.mrb[7].mxu1  ;;  %v1902_v13 = vadd.f32 %v3252_v22, %v885_v4 }
 0x1f5   : > { %v880_v44 = vadd.f32 %v2296_v18, %v879_v43  ;;  %v1608_v10 = vadd.f32 %v3252_v22, %v877_v6 }
 0x1f6   : > { %v2665_v45 = vpop.eup %2664  ;;  %v1903_v14 = vadd.f32 %v3257_v24, %v888_v42  ;;  %v2350_v18 = vmul.f32 -1.442695, %v1902_v13 }
 0x1f7   : > { %v2667_v46 = vpop.eup %2666  ;;  %v1322_v47 = vadd.f32 1.0, %v2665_v45  ;;  %v1609_v11 = vadd.f32 %v3257_v24, %v880_v44  ;;  %v2336_v16 = vmul.f32 -1.442695, %v1608_v10 }
 0x1f8   : > { %v2669_v48 = vpop.eup %2668  ;;  %v1020_v49 = vadd.f32 1.0, %v2667_v46  ;;  %v915_v50 = vpop.permute.xlu0 %914  ;;  %v2351_v21 = vmul.f32 -1.442695, %v1903_v14 }
 0x1f9   : > { %v2671_v40 = vpop.eup %2670  ;;  %2672 = vrcp.f32 %v1322_v47  ;;  %v1323_v51 = vadd.f32 1.0, %v2669_v48  ;;  %2437 = vmatprep.mubr.msk.bf16.mxu1 %vm580_vm4, %v915_v50  ;;  %v2337_v17 = vmul.f32 -1.442695, %v1609_v11 }
 0x1fa   : > { %2674 = vrcp.f32 %v1020_v49  ;;  %v1021_v53 = vadd.f32 1.0, %v2671_v40 }
 0x1fb   : > { %2676 = vrcp.f32 %v1323_v51 }
 0x1fc   : > { %2678 = vrcp.f32 %v1021_v53 }
 0x1fd   : > { %2680 = vpow2.f32 %v2336_v16 }
 0x1fe   : > { %2682 = vpow2.f32 %v2337_v17 }
 0x1ff   : > { %2684 = vpow2.f32 %v2350_v18 }
 0x200   : > { %v917_v19 = vpop.permute.xlu1 %916  ;;  %2686 = vpow2.f32 %v2351_v21 }
 0x201   : > { %2438 = vmatmul.mubr.msk.bf16.gmra.mrb[12].mxu1 %vm580_vm4, %v917_v19 }
 0x203   : > { %v2673_v56 = vpop.eup %2672 }
 0x204   : > { %v2675_v57 = vpop.eup %2674  ;;  %v3267_v60 = vmul.f32 %v2673_v56, %v1314_v26 }
 0x205   : > { %v2677_v20 = vpop.eup %2676  ;;  %v1026_v62 = vmul.f32 %v2675_v57, %v1012_v31 }
 0x206   : > { %v2679_v58 = vpop.eup %2678  ;;  %v3269_v61 = vmul.f32 %v2677_v20, %v1315_v35 }
 0x207   : > { %v1027_v0 = vmul.f32 %v2679_v58, %v1013_v37  ;;  %v2681_v3 = vpop.eup %2680 }
 0x208   : > { %v1346_v2 = vpack.c.bf16 %v3269_v61, %v3267_v60  ;;  %v2683_v5 = vpop.eup %2682  ;;  %v1616_v26 = vadd.f32 1.0, %v2681_v3  ;;  %v1011_v60 = vld [vmem:[%s3578_s10] sm:$0x7] }
 0x209   : > { %v1044_v8 = vpack.c.bf16 %v1027_v0, %v1026_v62  ;;  %v2685_v9 = vpop.eup %2684  ;;  %v1617_v27 = vadd.f32 1.0, %v2683_v5 }
 0x20a   : > { %v2687_v23 = vpop.eup %2686  ;;  %v1910_v28 = vadd.f32 1.0, %v2685_v9  ;;  %2688 = vrcp.f32 %v1616_v26 }
 0x20b   : > { %1046 = vxpose.xlu0.c.b16.start.end [1/1] (short) (narrow) %v1044_v8, 32  ;;  %v1911_v29 = vadd.f32 1.0, %v2687_v23  ;;  %2690 = vrcp.f32 %v1617_v27 }
 0x20c   : > { %2692 = vrcp.f32 %v1910_v28 }
 0x20d   : > { %2694 = vrcp.f32 %v1911_v29 }
 0x214   : > { %v2689_v31 = vpop.eup %2688 }
 0x215   : > { %v2691_v32 = vpop.eup %2690  ;;  %v3277_v36 = vmul.f32 %v2689_v31, %v1608_v10 }
 0x216   : > { %v2693_v33 = vpop.eup %2692  ;;  %v3279_v37 = vmul.f32 %v2691_v32, %v1609_v11 }
 0x217   : > { %v2695_v35 = vpop.eup %2694  ;;  %v3281_v38 = vmul.f32 %v2693_v33, %v1902_v13 }
 0x218   : > { %v3283_v25 = vmul.f32 %v2695_v35, %v1903_v14  ;;  %v1640_v39 = vpack.c.bf16 %v3279_v37, %v3277_v36 }
 0x21a   : > { %v1934_v30 = vpack.c.bf16 %v3283_v25, %v3281_v38 }
 0x271   : > { %v1054_v4 = vpop.trf.xlu0 }
 0x272   : > { %2443 = vmatprep.mubr.msk.bf16.mxu1 %vm1062_vm7, %v1054_v4 }
 0x2c4   : > { %v2435_v6 = vpop.f32.mrb[8].mxu1 }
 0x2c5   : > { %v985_v41 = vadd.f32 %v2435_v6, %v2303_v34  ;;  %v976_v42 = vpop.f32.mrb[9].mxu1 }
 0x2c6   : > { %v977_v43 = vadd.f32 %v2303_v34, %v976_v42  ;;  %v2436_v44 = vpop.f32.mrb[10].mxu1 }
 0x2c7   : > { %v1330_v45 = vadd.f32 %v3252_v22, %v985_v41  ;;  %v988_v46 = vadd.f32 %v2436_v44, %v2303_v34  ;;  %v979_v47 = vpop.f32.mrb[11].mxu1 }
 0x2c8   : > { %v1028_v48 = vadd.f32 %v3252_v22, %v977_v43  ;;  %v980_v49 = vadd.f32 %v2303_v34, %v979_v47 }
 0x2c9   : > { %v2324_v50 = vmul.f32 -1.442695, %v1330_v45  ;;  %v1331_v40 = vadd.f32 %v3257_v24, %v988_v46 }
 0x2ca   : > { %v2312_v51 = vmul.f32 -1.442695, %v1028_v48  ;;  %v1029_v53 = vadd.f32 %v3257_v24, %v980_v49 }
 0x2cb   : > { %2696 = vpow2.f32 %v2324_v50  ;;  %v2325_v56 = vmul.f32 -1.442695, %v1331_v40 }
 0x2cc   : > { %2698 = vpow2.f32 %v2312_v51  ;;  %v2313_v57 = vmul.f32 -1.442695, %v1029_v53 }
 0x2cd   : > { %2700 = vpow2.f32 %v2325_v56 }
 0x2ce   : > { %2702 = vpow2.f32 %v2313_v57 }
 0x2d4   : > { %v2439_v11 = vpop.f32.mrb[12].mxu1 }
 0x2d5   : > { %v2697_v19 = vpop.eup %2696  ;;  %v1001_v14 = vadd.f32 %v2439_v11, %v2303_v34  ;;  %v992_v16 = vpop.f32.mrb[13].mxu1 }
 0x2d6   : > { %v2699_v20 = vpop.eup %2698  ;;  %v1338_v58 = vadd.f32 1.0, %v2697_v19  ;;  %v993_v17 = vadd.f32 %v2303_v34, %v992_v16  ;;  %v2440_v18 = vpop.f32.mrb[14].mxu1 }
 0x2d7   : > { %v2701_v62 = vpop.eup %2700  ;;  %v1036_v0 = vadd.f32 1.0, %v2699_v20  ;;  %v1004_v21 = vadd.f32 %v2440_v18, %v2303_v34  ;;  %v995_v3 = vpop.f32.mrb[15].mxu1  ;;  %v1918_v4 = vadd.f32 %v3252_v22, %v1001_v14 }
 0x2d8   : > { %v2703_v8 = vpop.eup %2702  ;;  %2704 = vrcp.f32 %v1338_v58  ;;  %v1339_v10 = vadd.f32 1.0, %v2701_v62  ;;  %v996_v5 = vadd.f32 %v2303_v34, %v995_v3  ;;  %v1624_v6 = vadd.f32 %v3252_v22, %v993_v17  ;;  %v1055_v34 = vpop.trf.xlu0 }
 0x2d9   : > { %2706 = vrcp.f32 %v1036_v0  ;;  %v1037_v13 = vadd.f32 1.0, %v2703_v8  ;;  %v1919_v41 = vadd.f32 %v3257_v24, %v1004_v21  ;;  %v2352_v43 = vmul.f32 -1.442695, %v1918_v4 }
 0x2da   : > { %2708 = vrcp.f32 %v1339_v10  ;;  %v1625_v42 = vadd.f32 %v3257_v24, %v996_v5  ;;  %v2338_v44 = vmul.f32 -1.442695, %v1624_v6 }
 0x2db   : > { %2710 = vrcp.f32 %v1037_v13 }
 0x2dc   : > { %v2339_v46 = vmul.f32 -1.442695, %v1625_v42  ;;  %2712 = vpow2.f32 %v2352_v43 }
 0x2dd   : > { %2714 = vpow2.f32 %v2338_v44 }
 0x2e2   : > { %v2705_v9 = vpop.eup %2704 }
 0x2e3   : > { %v2707_v23 = vpop.eup %2706  ;;  %v1344_v28 = vmul.f32 %v2705_v9, %v1330_v45  ;;  %v2353_v45 = vmul.f32 -1.442695, %v1919_v41 }
 0x2e4   : > { %v2709_v26 = vpop.eup %2708  ;;  %v1042_v31 = vmul.f32 %v2707_v23, %v1028_v48 }
 0x2e5   : > { %v2711_v27 = vpop.eup %2710  ;;  %v1345_v29 = vmul.f32 %v2709_v26, %v1331_v40  ;;  %2716 = vpow2.f32 %v2353_v45 }
 0x2e6   : > { %v1043_v32 = vmul.f32 %v2711_v27, %v1029_v53  ;;  %2718 = vpow2.f32 %v2339_v46  ;;  %v2713_v47 = vpop.eup %2712 }
 0x2e7   : > { %v3297_v33 = vpack.c.bf16 %v1345_v29, %v1344_v28  ;;  %v2715_v48 = vpop.eup %2714  ;;  %v1926_v50 = vadd.f32 1.0, %v2713_v47 }
 0x2e8   : > { %v1045_v35 = vpack.c.bf16 %v1043_v32, %v1042_v31  ;;  %v1632_v40 = vadd.f32 1.0, %v2715_v48 }
 0x2e9   : > { %2720 = vrcp.f32 %v1926_v50 }
 0x2ea   : > { %2441 = vmatprep.subr.bf16.mxu1 %v1045_v35  ;;  %2722 = vrcp.f32 %v1632_v40  ;;  %v2876_v40 = vmov 0.0|0.0  }
 0x2eb   : > { %2442 = vmatpush3.bf16.msra.mxu1 %v1045_v35  ;;  %2517 = vmatprep.subr.bf16.mxu0 %v2876_v40 }
 0x2ec   : > { %2509 = vmatprep.subr.bf16.mxu1 %v2876_v40 }
 0x2ee   : > { %2444 = vmatmul.mubr.msk.bf16.vlgmr.msra.gmra.mrb[16].mxu1 %vm1062_vm7, %v1055_v34 }
 0x2ef   : > { %v2717_v22 = vpop.eup %2716 }
 0x2f0   : > { %v2719_v49 = vpop.eup %2718  ;;  %v1927_v51 = vadd.f32 1.0, %v2717_v22 }
 0x2f1   : > { %v1633_v53 = vadd.f32 1.0, %v2719_v49 }
 0x2f2   : > { %2724 = vrcp.f32 %v1927_v51  ;;  %v2878_v51 = vmov 0.0  }
 0x2f3   : > { %2726 = vrcp.f32 %v1633_v53  ;;  %v2721_v24 = vpop.eup %2720  ;;  %2455 = vmatprep.mubr.msk.f32.mxu1 %vm2877_vm8, %v2878_v51  ;;  %2472 = vmatprep.mubr.msk.f32.mxu0 %vm2877_vm8, %v2878_v51 }
 0x2f4   : > { %v2723_v56 = vpop.eup %2722  ;;  %v1932_v20 = vmul.f32 %v2721_v24, %v1918_v4 }
 0x2f5   : > { %v1638_v58 = vmul.f32 %v2723_v56, %v1624_v6 }
 0x2fc   : > { %v2725_v57 = vpop.eup %2724 }
 0x2fd   : > { %v2727_v19 = vpop.eup %2726  ;;  %v1933_v62 = vmul.f32 %v2725_v57, %v1919_v41 }
 0x2fe   : > { %v1639_v0 = vmul.f32 %v2727_v19, %v1625_v42 }
 0x2ff   : > { %v3306_v10 = vpack.c.bf16 %v1933_v62, %v1932_v20 }
 0x300   : > { %v3304_v8 = vpack.c.bf16 %v1639_v0, %v1638_v58 }
 0x3c1   : > { %v2445_v11 = vpop.f32.mrb[16].mxu1 }
 0x3c2   : > { %v1103_v13 = vpop.f32.mrb[17].mxu1  ;;  %v1120_v18 = vmul.f32 0.25, %v2445_v11 }
 0x3c3   : > { %v1118_v14 = vmul.f32 0.25, %v1103_v13  ;;  %v2446_v16 = vpop.f32.mrb[18].mxu1  ;;  %v3343_v13 = vld [vmem:[%s3575_s7] sm:$0x7] }
 0x3c4   : > { %v1106_v17 = vpop.f32.mrb[19].mxu1  ;;  %v1121_v9 = vmul.f32 0.25, %v2446_v16  ;;  %v1128_v23 = vsel %vm580_vm4, %v1120_v18, -inf }
 0x3c5   : > { %v1119_v21 = vmul.f32 0.25, %v1106_v17  ;;  %v1122_v3 = vsel %vm580_vm4, %v1118_v14, -inf }
 0x3c6   : > { %1123 = vmax.xlane.f32.xlu1 %v1122_v3  ;;  %v1131_v26 = vsel %vm580_vm4, %v1121_v9, -inf }
 0x3c7   : > { %v1125_v5 = vsel %vm580_vm4, %v1119_v21, -inf }
 0x3c8   : > { %1126 = vmax.xlane.f32.xlu0 %v1125_v5 }
 0x3ca   : > { %1129 = vmax.xlane.f32.xlu1 %v1128_v23 }
 0x3ce   : > { %1132 = vmax.xlane.f32.xlu1 %v1131_v26 }
 0x453   : > { %v1124_v27 = vpop.xlane.xlu1 %1123 }
 0x454   : > { %v1134_v28 = vsub.f32 %v1118_v14, %v1124_v27 }
 0x455   : > { %v1127_v29 = vpop.xlane.xlu0 %1126 }
 0x456   : > { %v1138_v31 = vmul.f32 1.442695, %v1134_v28  ;;  %v1135_v32 = vsub.f32 %v1119_v21, %v1127_v29 }
 0x457   : > { %v1130_v35 = vpop.xlane.xlu1 %1129 }
 0x458   : > { %2728 = vpow2.f32 %v1138_v31  ;;  %v1140_v4 = vmul.f32 1.442695, %v1135_v32  ;;  %v1136_v6 = vsub.f32 %v1120_v18, %v1130_v35 }
 0x45a   : > { %2730 = vpow2.f32 %v1140_v4  ;;  %v1142_v41 = vmul.f32 1.442695, %v1136_v6 }
 0x45b   : > { %v1133_v34 = vpop.xlane.xlu1 %1132 }
 0x45c   : > { %2732 = vpow2.f32 %v1142_v41  ;;  %v1137_v42 = vsub.f32 %v1121_v9, %v1133_v34 }
 0x45e   : > { %v1144_v43 = vmul.f32 1.442695, %v1137_v42 }
 0x460   : > { %2734 = vpow2.f32 %v1144_v43 }
 0x462   : > { %v2729_v44 = vpop.eup %2728 }
 0x463   : > { %v1146_v45 = vsel %vm580_vm4, %v2729_v44, 0.0 }
 0x464   : > { %v2731_v46 = vpop.eup %2730  ;;  %1147 = vadd.xlane.f32.xlu1 %v1146_v45 }
 0x465   : > { %v1149_v47 = vsel %vm580_vm4, %v2731_v46, 0.0 }
 0x466   : > { %v2733_v48 = vpop.eup %2732  ;;  %1150 = vadd.xlane.f32.xlu0 %v1149_v47 }
 0x467   : > { %v1152_v22 = vsel %vm580_vm4, %v2733_v48, 0.0 }
 0x468   : > { %1153 = vadd.xlane.f32.xlu1 %v1152_v22 }
 0x46a   : > { %v2735_v49 = vpop.eup %2734 }
 0x46b   : > { %v1155_v50 = vsel %vm580_vm4, %v2735_v49, 0.0 }
 0x46c   : > { %1156 = vadd.xlane.f32.xlu0 %v1155_v50 }
 0x495   : > { %1348 = vxpose.xlu1.c.b16.start.end [1/1] (short) (narrow) %v1346_v2, 32 }
 0x49a   : > { %1936 = vxpose.xlu1.c.b16.start.end [1/1] (short) (narrow) %v1934_v30, 32 }
 0x4f1   : > { %v1148_v53 = vpop.xlane.xlu1 %1147 }
 0x4f2   : > { %2736 = vrcp.f32 %v1148_v53 }
 0x4f3   : > { %v1151_v24 = vpop.xlane.xlu0 %1150 }
 0x4f4   : > { %2738 = vrcp.f32 %v1151_v24 }
 0x4f5   : > { %v1154_v56 = vpop.xlane.xlu1 %1153 }
 0x4f6   : > { %2740 = vrcp.f32 %v1154_v56 }
 0x4f9   : > { %v1157_v57 = vpop.xlane.xlu0 %1156 }
 0x4fa   : > { %2742 = vrcp.f32 %v1157_v57 }
 0x4fb   : > { %v1356_v11 = vpop.trf.xlu1 }
 0x4fc   : > { %v2737_v19 = vpop.eup %2736 }
 0x4fd   : > { %v1162_v58 = vmul.f32 %v2737_v19, %v2729_v44 }
 0x4fe   : > { %v2739_v20 = vpop.eup %2738 }
 0x4ff   : > { %v1163_v62 = vmul.f32 %v2739_v20, %v2731_v46  ;;  %v1357_v14 = vpop.trf.xlu1 }
 0x500   : > { %v2741_v2 = vpop.eup %2740 }
 0x501   : > { %v2510_v61 = vpack.c.bf16 %v1163_v62, %v1162_v58  ;;  %v1164_v30 = vmul.f32 %v2741_v2, %v2733_v48 }
 0x503   : > { %2512 = vmatpush3.bf16.xpose.msk.msra.mxu1 %vm3330_vm9, %v2510_v61 }
 0x504   : > { %v2743_v38 = vpop.eup %2742  ;;  %2513 = vmatprep.subr.bf16.mxu1 %v2876_v40 }
 0x505   : > { %v1165_v25 = vmul.f32 %v2743_v38, %v2735_v49 }
 0x507   : > { %v2514_v0 = vpack.c.bf16 %v1165_v25, %v1164_v30 }
 0x50b   : > { %2516 = vmatpush3.bf16.xpose.msk.msra.mxu1 %vm3330_vm9, %v2514_v0 }
 0x50c   : > { %2458 = vmatprep.subr.bf16.mxu1 %v3297_v33 }
 0x512   : > { %2456 = vmatmul.mubr.msk.f32.vlgmr.msra.gmra.mrb[20].mxu1 %vm580_vm4, %v3343_v13 }
 0x513   : > { %2459 = vmatpush3.bf16.msra.mxu1 %v3297_v33  ;;  %2460 = vmatprep.mubr.msk.bf16.mxu1 %vm1062_vm7, %v1356_v11 }
 0x514   : > { %2475 = vmatprep.subr.bf16.mxu1 %v3304_v8 }
 0x516   : > { %2461 = vmatmul.mubr.msk.bf16.vlgmr.msra.gmra.mrb[24].mxu1 %vm1062_vm7, %v1357_v14  ;;  %v1944_v14 = vpop.trf.xlu1 }
 0x517   : > { %2476 = vmatpush3.bf16.msra.mxu1 %v3304_v8 }
 0x518   : > { %2525 = vmatprep.subr.bf16.mxu1 %v2876_v40 }
 0x5e5   : > { %v3353_v16 = vpop.f32.mrb[20].mxu1 }
 0x5e6   : > { %v2457_v17 = vpop.f32.mrb[21].mxu1 }
 0x5e7   : > { %v1945_v17 = vpop.trf.xlu1 }
 0x5e9   : > { %v2462_v18 = vpop.f32.mrb[24].mxu1 }
 0x5ea   : > { %v1404_v21 = vpop.f32.mrb[25].mxu1  ;;  %v1421_v26 = vmul.f32 0.25, %v2462_v18 }
 0x5eb   : > { %v1419_v3 = vmul.f32 0.25, %v1404_v21  ;;  %v2463_v5 = vpop.f32.mrb[26].mxu1 }
 0x5ec   : > { %v1407_v9 = vpop.f32.mrb[27].mxu1  ;;  %v1422_v28 = vmul.f32 0.25, %v2463_v5  ;;  %v1429_v8 = vsel %vm580_vm4, %v1421_v26, -inf }
 0x5ed   : > { %v1420_v33 = vmul.f32 0.25, %v1407_v9  ;;  %v1423_v23 = vsel %vm580_vm4, %v1419_v3, -inf }
 0x5ee   : > { %1424 = vmax.xlane.f32.xlu0 %v1423_v23  ;;  %v1432_v29 = vsel %vm580_vm4, %v1422_v28, -inf }
 0x5ef   : > { %v1426_v27 = vsel %vm580_vm4, %v1420_v33, -inf }
 0x5f2   : > { %1427 = vmax.xlane.f32.xlu0 %v1426_v27 }
 0x5f6   : > { %1430 = vmax.xlane.f32.xlu0 %v1429_v8 }
 0x5fa   : > { %1433 = vmax.xlane.f32.xlu0 %v1432_v29 }
 0x67b   : > { %v1425_v31 = vpop.xlane.xlu0 %1424 }
 0x67c   : > { %v1435_v32 = vsub.f32 %v1419_v3, %v1425_v31 }
 0x67e   : > { %v1439_v35 = vmul.f32 1.442695, %v1435_v32 }
 0x67f   : > { %v1428_v4 = vpop.xlane.xlu0 %1427 }
 0x680   : > { %2744 = vpow2.f32 %v1439_v35  ;;  %v1436_v6 = vsub.f32 %v1420_v33, %v1428_v4 }
 0x682   : > { %v1441_v41 = vmul.f32 1.442695, %v1436_v6 }
 0x683   : > { %v1431_v34 = vpop.xlane.xlu0 %1430 }
 0x684   : > { %2746 = vpow2.f32 %v1441_v41  ;;  %v1437_v42 = vsub.f32 %v1421_v26, %v1431_v34 }
 0x686   : > { %v1443_v43 = vmul.f32 1.442695, %v1437_v42 }
 0x687   : > { %v1434_v44 = vpop.xlane.xlu0 %1433 }
 0x688   : > { %2748 = vpow2.f32 %v1443_v43  ;;  %v1438_v45 = vsub.f32 %v1422_v28, %v1434_v44 }
 0x68a   : > { %v2745_v46 = vpop.eup %2744  ;;  %v1445_v47 = vmul.f32 1.442695, %v1438_v45 }
 0x68b   : > { %v1447_v48 = vsel %vm580_vm4, %v2745_v46, 0.0 }
 0x68c   : > { %2750 = vpow2.f32 %v1445_v47  ;;  %1448 = vadd.xlane.f32.xlu0 %v1447_v48 }
 0x68e   : > { %v2747_v22 = vpop.eup %2746 }
 0x68f   : > { %v1450_v49 = vsel %vm580_vm4, %v2747_v22, 0.0 }
 0x690   : > { %1451 = vadd.xlane.f32.xlu0 %v1450_v49 }
 0x692   : > { %v2749_v50 = vpop.eup %2748 }
 0x693   : > { %v1453_v53 = vsel %vm580_vm4, %v2749_v50, 0.0 }
 0x694   : > { %1454 = vadd.xlane.f32.xlu0 %v1453_v53 }
 0x696   : > { %v2751_v24 = vpop.eup %2750 }
 0x697   : > { %v1456_v56 = vsel %vm580_vm4, %v2751_v24, 0.0 }
 0x698   : > { %1457 = vadd.xlane.f32.xlu0 %v1456_v56 }
 0x6c5   : > { %1642 = vxpose.xlu0.c.b16.start.end [1/1] (short) (narrow) %v1640_v39, 32 }
 0x6ce   : > { %2649 = vset.pattern.permute.xlu0 %v2872_v1 }
 0x719   : > { %v1449_v57 = vpop.xlane.xlu0 %1448 }
 0x71a   : > { %2752 = vrcp.f32 %v1449_v57 }
 0x71d   : > { %v1452_v19 = vpop.xlane.xlu0 %1451 }
 0x71e   : > { %2754 = vrcp.f32 %v1452_v19 }
 0x721   : > { %v1455_v20 = vpop.xlane.xlu0 %1454 }
 0x722   : > { %2756 = vrcp.f32 %v1455_v20 }
 0x724   : > { %v2753_v62 = vpop.eup %2752 }
 0x725   : > { %v1458_v58 = vpop.xlane.xlu0 %1457  ;;  %v1463_v2 = vmul.f32 %v2753_v62, %v2745_v46 }
 0x726   : > { %2758 = vrcp.f32 %v1458_v58 }
 0x728   : > { %v2755_v61 = vpop.eup %2754 }
 0x729   : > { %v1464_v38 = vmul.f32 %v2755_v61, %v2747_v22 }
 0x72b   : > { %v1650_v25 = vpop.trf.xlu0  ;;  %v2518_v30 = vpack.c.bf16 %v1464_v38, %v1463_v2 }
 0x72c   : > { %2477 = vmatprep.mubr.msk.bf16.mxu1 %vm1062_vm7, %v1650_v25  ;;  %v2757_v1 = vpop.eup %2756 }
 0x72d   : > { %2520 = vmatpush3.bf16.xpose.msk.msra.mxu0 %vm3330_vm9, %v2518_v30  ;;  %v1465_v39 = vmul.f32 %v2757_v1, %v2749_v50 }
 0x72e   : > { %2521 = vmatprep.subr.bf16.mxu0 %v2876_v40 }
 0x72f   : > { %v1651_v36 = vpop.trf.xlu0 }
 0x730   : > { %v2759_v37 = vpop.eup %2758  ;;  %2478 = vmatmul.mubr.msk.bf16.vlgmr.msra.gmra.mrb[28].mxu1 %vm1062_vm7, %v1651_v36 }
 0x731   : > { %v1466_v0 = vmul.f32 %v2759_v37, %v2751_v24  ;;  %2489 = vmatprep.mubr.msk.f32.mxu1 %vm2877_vm8, %v2878_v51 }
 0x733   : > { %v2522_v11 = vpack.c.bf16 %v1466_v0, %v1465_v39 }
 0x735   : > { %2524 = vmatpush3.bf16.xpose.msk.msra.mxu0 %vm3330_vm9, %v2522_v11 }
 0x736   : > { %2492 = vmatprep.subr.bf16.mxu0 %v3306_v10 }
 0x73c   : > { %2473 = vmatmul.mubr.msk.f32.vlgmr.msra.gmra.mrb[16].mxu0 %vm580_vm4, %v3343_v13 }
 0x73d   : > { %2493 = vmatpush3.bf16.msra.mxu0 %v3306_v10  ;;  %2494 = vmatprep.mubr.msk.bf16.mxu0 %vm1062_vm7, %v1944_v14 }
 0x73e   : > { %2533 = vmatprep.subr.bf16.mxu0 %v2876_v40 }
 0x740   : > { %2495 = vmatmul.mubr.msk.bf16.vlgmr.msra.gmra.mrb[20].mxu0 %vm1062_vm7, %v1945_v17 }
 0x741   : > { %2506 = vmatprep.mubr.msk.f32.mxu0 %vm2877_vm8, %v2878_v51 }
 0x803   : > { %v2479_v18 = vpop.f32.mrb[28].mxu1 }
 0x804   : > { %v1698_v21 = vpop.f32.mrb[29].mxu1  ;;  %v1715_v28 = vmul.f32 0.25, %v2479_v18 }
 0x805   : > { %v1713_v3 = vmul.f32 0.25, %v1698_v21  ;;  %v2480_v5 = vpop.f32.mrb[30].mxu1 }
 0x806   : > { %v1716_v9 = vmul.f32 0.25, %v2480_v5  ;;  %v1701_v33 = vpop.f32.mrb[31].mxu1  ;;  %v1723_v8 = vsel %vm580_vm4, %v1715_v28, -inf }
 0x807   : > { %v1717_v23 = vsel %vm580_vm4, %v1713_v3, -inf  ;;  %v1714_v26 = vmul.f32 0.25, %v1701_v33 }
 0x808   : > { %1718 = vmax.xlane.f32.xlu1 %v1717_v23  ;;  %v1726_v10 = vsel %vm580_vm4, %v1716_v9, -inf }
 0x809   : > { %1727 = vmax.xlane.f32.xlu0 %v1726_v10  ;;  %v1720_v27 = vsel %vm580_vm4, %v1714_v26, -inf }
 0x80c   : > { %1721 = vmax.xlane.f32.xlu1 %v1720_v27 }
 0x80f   : > { %v3389_v51 = vpop.f32.mrb[16].mxu0 }
 0x810   : > { %1724 = vmax.xlane.f32.xlu1 %v1723_v8  ;;  %v2474_v29 = vpop.f32.mrb[17].mxu0 }
 0x813   : > { %v2496_v31 = vpop.f32.mrb[20].mxu0 }
 0x814   : > { %v1992_v32 = vpop.f32.mrb[21].mxu0  ;;  %v2009_v42 = vmul.f32 0.25, %v2496_v31 }
 0x815   : > { %v2007_v35 = vmul.f32 0.25, %v1992_v32  ;;  %v2497_v4 = vpop.f32.mrb[22].mxu0  ;;  %v1010_v32 = vld [vmem:[%s3576_s8] sm:$0x7] }
 0x816   : > { %v1995_v6 = vpop.f32.mrb[23].mxu0  ;;  %v2010_v44 = vmul.f32 0.25, %v2497_v4  ;;  %v2017_v45 = vsel %vm580_vm4, %v2009_v42, -inf }
 0x817   : > { %v2008_v41 = vmul.f32 0.25, %v1995_v6  ;;  %v2011_v34 = vsel %vm580_vm4, %v2007_v35, -inf }
 0x818   : > { %2012 = vmax.xlane.f32.xlu1 %v2011_v34  ;;  %v2020_v46 = vsel %vm580_vm4, %v2010_v44, -inf }
 0x819   : > { %v2014_v43 = vsel %vm580_vm4, %v2008_v41, -inf }
 0x81c   : > { %2015 = vmax.xlane.f32.xlu1 %v2014_v43 }
 0x820   : > { %2018 = vmax.xlane.f32.xlu1 %v2017_v45 }
 0x824   : > { %2021 = vmax.xlane.f32.xlu1 %v2020_v46 }
 0x895   : > { %v1719_v47 = vpop.xlane.xlu1 %1718 }
 0x896   : > { %v1729_v48 = vsub.f32 %v1713_v3, %v1719_v47  ;;  %v1728_v19 = vpop.xlane.xlu0 %1727 }
 0x897   : > { %v1732_v2 = vsub.f32 %v1716_v9, %v1728_v19 }
 0x898   : > { %v1733_v22 = vmul.f32 1.442695, %v1729_v48 }
 0x899   : > { %v1722_v49 = vpop.xlane.xlu1 %1721  ;;  %v1739_v37 = vmul.f32 1.442695, %v1732_v2 }
 0x89a   : > { %2760 = vpow2.f32 %v1733_v22  ;;  %v1730_v50 = vsub.f32 %v1714_v26, %v1722_v49 }
 0x89c   : > { %v1735_v53 = vmul.f32 1.442695, %v1730_v50 }
 0x89d   : > { %v1725_v24 = vpop.xlane.xlu1 %1724 }
 0x89e   : > { %2762 = vpow2.f32 %v1735_v53  ;;  %v1731_v57 = vsub.f32 %v1715_v28, %v1725_v24 }
 0x8a0   : > { %v1737_v38 = vmul.f32 1.442695, %v1731_v57 }
 0x8a4   : > { %v2761_v56 = vpop.eup %2760 }
 0x8a5   : > { %v2013_v20 = vpop.xlane.xlu1 %2012  ;;  %v1741_v58 = vsel %vm580_vm4, %v2761_v56, 0.0 }
 0x8a6   : > { %v2023_v62 = vsub.f32 %v2007_v35, %v2013_v20  ;;  %1742 = vadd.xlane.f32.xlu1 %v1741_v58 }
 0x8a8   : > { %v2763_v61 = vpop.eup %2762  ;;  %v2027_v25 = vmul.f32 1.442695, %v2023_v62 }
 0x8a9   : > { %v2016_v30 = vpop.xlane.xlu1 %2015  ;;  %v1744_v1 = vsel %vm580_vm4, %v2763_v61, 0.0 }
 0x8aa   : > { %2764 = vpow2.f32 %v2027_v25  ;;  %v2024_v36 = vsub.f32 %v2008_v41, %v2016_v30  ;;  %1745 = vadd.xlane.f32.xlu1 %v1744_v1 }
 0x8ab   : > { %2766 = vpow2.f32 %v1737_v38 }
 0x8ac   : > { %v2029_v39 = vmul.f32 1.442695, %v2024_v36 }
 0x8ad   : > { %v2019_v0 = vpop.xlane.xlu1 %2018 }
 0x8ae   : > { %2768 = vpow2.f32 %v2029_v39  ;;  %v2025_v11 = vsub.f32 %v2009_v42, %v2019_v0 }
 0x8af   : > { %2770 = vpow2.f32 %v1739_v37 }
 0x8b0   : > { %v2031_v14 = vmul.f32 1.442695, %v2025_v11 }
 0x8b1   : > { %v2022_v17 = vpop.xlane.xlu1 %2021 }
 0x8b2   : > { %2772 = vpow2.f32 %v2031_v14  ;;  %v2026_v18 = vsub.f32 %v2010_v44, %v2022_v17 }
 0x8b4   : > { %v2765_v21 = vpop.eup %2764  ;;  %v2033_v3 = vmul.f32 1.442695, %v2026_v18 }
 0x8b5   : > { %v2035_v5 = vsel %vm580_vm4, %v2765_v21, 0.0  ;;  %v2767_v9 = vpop.eup %2766 }
 0x8b6   : > { %2774 = vpow2.f32 %v2033_v3  ;;  %2036 = vadd.xlane.f32.xlu0 %v2035_v5  ;;  %v1747_v23 = vsel %vm580_vm4, %v2767_v9, 0.0 }
 0x8b8   : > { %v2769_v33 = vpop.eup %2768 }
 0x8b9   : > { %v2038_v26 = vsel %vm580_vm4, %v2769_v33, 0.0  ;;  %v2771_v10 = vpop.eup %2770 }
 0x8ba   : > { %1748 = vadd.xlane.f32.xlu0 %v1747_v23  ;;  %2039 = vadd.xlane.f32.xlu1 %v2038_v26  ;;  %v1750_v28 = vsel %vm580_vm4, %v2771_v10, 0.0 }
 0x8bc   : > { %v2773_v27 = vpop.eup %2772 }
 0x8bd   : > { %v2041_v8 = vsel %vm580_vm4, %v2773_v27, 0.0 }
 0x8be   : > { %1751 = vadd.xlane.f32.xlu1 %v1750_v28  ;;  %2042 = vadd.xlane.f32.xlu0 %v2041_v8 }
 0x8c0   : > { %v2775_v29 = vpop.eup %2774 }
 0x8c1   : > { %v2044_v31 = vsel %vm580_vm4, %v2775_v29, 0.0 }
 0x8c2   : > { %2045 = vadd.xlane.f32.xlu1 %v2044_v31 }
 0x8d4   : > { %1168 = vperm.xlu0 %2649, %v1010_v32  }
 0x933   : > { %v1743_v35 = vpop.xlane.xlu1 %1742 }
 0x934   : > { %2776 = vrcp.f32 %v1743_v35 }
 0x937   : > { %v1746_v4 = vpop.xlane.xlu1 %1745 }
 0x938   : > { %2778 = vrcp.f32 %v1746_v4 }
 0x93e   : > { %v2777_v6 = vpop.eup %2776 }
 0x93f   : > { %v1757_v34 = vmul.f32 %v2777_v6, %v2761_v56 }
 0x942   : > { %v2779_v41 = vpop.eup %2778 }
 0x943   : > { %v1758_v42 = vmul.f32 %v2779_v41, %v2763_v61  ;;  %v2037_v43 = vpop.xlane.xlu0 %2036 }
 0x944   : > { %2780 = vrcp.f32 %v2037_v43 }
 0x945   : > { %v2526_v44 = vpack.c.bf16 %v1758_v42, %v1757_v34 }
 0x947   : > { %v1749_v45 = vpop.xlane.xlu0 %1748  ;;  %2528 = vmatpush3.bf16.xpose.msk.msra.mxu1 %vm3330_vm9, %v2526_v44  ;;  %v2040_v46 = vpop.xlane.xlu1 %2039 }
 0x948   : > { %2529 = vmatprep.subr.bf16.mxu1 %v2876_v40  ;;  %2782 = vrcp.f32 %v2040_v46 }
 0x949   : > { %2784 = vrcp.f32 %v1749_v45 }
 0x94b   : > { %v2043_v47 = vpop.xlane.xlu0 %2042  ;;  %v1752_v48 = vpop.xlane.xlu1 %1751 }
 0x94c   : > { %2786 = vrcp.f32 %v1752_v48 }
 0x94d   : > { %2788 = vrcp.f32 %v2043_v47 }
 0x94e   : > { %v2781_v49 = vpop.eup %2780 }
 0x94f   : > { %v2046_v22 = vpop.xlane.xlu1 %2045  ;;  %v2051_v24 = vmul.f32 %v2781_v49, %v2765_v21 }
 0x950   : > { %2790 = vrcp.f32 %v2046_v22 }
 0x952   : > { %v2783_v50 = vpop.eup %2782 }
 0x953   : > { %v3409_v53 = vpop.permute.xlu0 %1168  ;;  %v2052_v56 = vmul.f32 %v2783_v50, %v2769_v33  ;;  %v2785_v20 = vpop.eup %2784 }
 0x954   : > { %v1253_v57 = vadd.f32 %v3353_v16, %v3409_v53  ;;  %v1546_v19 = vadd.f32 %v3389_v51, %v3409_v53  ;;  %v1759_v25 = vmul.f32 %v2785_v20, %v2767_v9 }
 0x955   : > { %v2534_v61 = vpack.c.bf16 %v2052_v56, %v2051_v24 }
 0x956   : > { %v2321_v58 = vmul.f32 -1.442695, %v1253_v57  ;;  %v2333_v62 = vmul.f32 -1.442695, %v1546_v19  ;;  %v2787_v2 = vpop.eup %2786 }
 0x957   : > { %v2789_v38 = vpop.eup %2788  ;;  %v1760_v30 = vmul.f32 %v2787_v2, %v2771_v10  ;;  %2536 = vmatpush3.bf16.xpose.msk.msra.mxu0 %vm3330_vm9, %v2534_v61 }
 0x958   : > { %2792 = vpow2.f32 %v2321_v58  ;;  %2537 = vmatprep.subr.bf16.mxu0 %v2876_v40  ;;  %v2053_v36 = vmul.f32 %v2789_v38, %v2773_v27  ;;  %v1264_v40 = vlaneseq }
 0x959   : > { %2794 = vpow2.f32 %v2333_v62  ;;  %v2530_v16 = vpack.c.bf16 %v1760_v30, %v1759_v25 }
 0x95a   : > { %v2791_v1 = vpop.eup %2790  ;;  %v1265_v17 = vshrl.u32 %v1264_v40, 7 }
 0x95b   : > { %v2054_v37 = vmul.f32 %v2791_v1, %v2775_v29  ;;  %2532 = vmatpush3.bf16.xpose.msk.msra.mxu1 %vm3330_vm9, %v2530_v16 }
 0x95c   : > { %v1272_v5 = vsub.s32 1, %v1265_v17  ;;  %v1292_v9 = vsub.s32 2, %v1265_v17  ;;  %v1266_v33 = vsub.s32 0, %v1265_v17 }
 0x95d   : > { %v2538_v51 = vpack.c.bf16 %v2054_v37, %v2053_v36 }
 0x95f   : > { %2540 = vmatpush3.bf16.xpose.msk.msra.mxu0 %vm3330_vm9, %v2538_v51 }
 0x962   : > { %v2793_v39 = vpop.eup %2792  ;;  %2490 = vmatmul.mubr.msk.f32.vlgmr.msra.gmra.mrb[22].mxu1 %vm580_vm4, %v3343_v13 }
 0x963   : > { %v2795_v0 = vpop.eup %2794  ;;  %v1259_v11 = vadd.f32 1.0, %v2793_v39 }
 0x964   : > { %v1552_v14 = vadd.f32 1.0, %v2795_v0 }
 0x965   : > { %2796 = vrcp.f32 %v1259_v11 }
 0x966   : > { %2798 = vrcp.f32 %v1552_v14  ;;  %2507 = vmatmul.mubr.msk.f32.vlgmr.msra.gmra.mrb[18].mxu0 %vm580_vm4, %v3343_v13 }
 0x96f   : > { %v2797_v18 = vpop.eup %2796 }
 0x970   : > { %v2799_v21 = vpop.eup %2798  ;;  %v1262_v3 = vmul.f32 %v2797_v18, %v1253_v57 }
 0x971   : > { %v1555_v23 = vmul.f32 %v2799_v21, %v1546_v19 }
 0x972   : > { %v1263_v26 = vmul.f32 %v1262_v3, %v1011_v60 }
 0x973   : > { %v1556_v10 = vmul.f32 %v1555_v23, %v1011_v60 }
 0x974   : > { %v1273_v27 = vrot.slane %v1263_v26, %v1272_v5  ;;  %v1293_v28 = vrot.slane %v1263_v26, %v1292_v9  ;;  %v3429_v8 = vrot.slane %v1263_v26, %v1266_v33 }
 0x975   : > { %v1586_v13 = vrot.slane %v1556_v10, %v1292_v9  ;;  %v3431_v29 = vrot.slane %v1556_v10, %v1266_v33  ;;  %v1566_v31 = vrot.slane %v1556_v10, %v1272_v5 }
 0x976   : > { %1275 = vrot.lane.b32.xlu1 %v1273_v27, %s2873_s13 }
 0x97a   : > { %1568 = vrot.lane.b32.xlu1 %v1566_v31, %s2873_s13 }
 0x9e8   : > { %v1276_v32 = vpop.permute.xlu1 %1275 }
 0x9e9   : > { %v1278_v35 = vmul.f32 %v1276_v32, %v3218_v54  ;;  %v1279_v30 = vmul.f32 %v1276_v32, %v3220_v55  ;;  %v1268_v32 = vmul.f32 %v3429_v8, %v3218_v54 }
 0x9eb   : > { %1282 = vrot.lane.b32.xlu0 %v1278_v35, %s2874_s14  ;;  %v1269_v35 = vmul.f32 %v3429_v8, %v3220_v55 }
 0x9ec   : > { %v1569_v4 = vpop.permute.xlu1 %1568 }
 0x9ed   : > { %v1571_v6 = vmul.f32 %v1569_v4, %v3225_v52  ;;  %v1572_v1 = vmul.f32 %v1569_v4, %v3227_v59 }
 0x9ef   : > { %1575 = vrot.lane.b32.xlu0 %v1571_v6, %s2874_s14 }
 0xa35   : > { %v1839_v41 = vpop.f32.mrb[22].mxu1 }
 0xa36   : > { %v1840_v34 = vadd.f32 %v1839_v41, %v3409_v53  ;;  %v2491_v42 = vpop.f32.mrb[23].mxu1 }
 0xa37   : > { %v1561_v42 = vmul.f32 %v3431_v29, %v3225_v52 }
 0xa38   : > { %v2347_v43 = vmul.f32 -1.442695, %v1840_v34 }
 0xa39   : > { %v2133_v44 = vpop.f32.mrb[18].mxu0 }
 0xa3a   : > { %2800 = vpow2.f32 %v2347_v43  ;;  %v2134_v45 = vadd.f32 %v2133_v44, %v3409_v53  ;;  %v2508_v46 = vpop.f32.mrb[19].mxu0  ;;  %v1562_v43 = vmul.f32 %v3431_v29, %v3227_v59 }
 0xa3c   : > { %v2361_v47 = vmul.f32 -1.442695, %v2134_v45 }
 0xa3e   : > { %2802 = vpow2.f32 %v2361_v47 }
 0xa44   : > { %v2801_v48 = vpop.eup %2800 }
 0xa45   : > { %v1846_v22 = vadd.f32 1.0, %v2801_v48 }
 0xa47   : > { %2804 = vrcp.f32 %v1846_v22 }
 0xa48   : > { %v2803_v49 = vpop.eup %2802 }
 0xa49   : > { %v2140_v50 = vadd.f32 1.0, %v2803_v49 }
 0xa4b   : > { %2806 = vrcp.f32 %v2140_v50 }
 0xa51   : > { %v2805_v24 = vpop.eup %2804 }
 0xa52   : > { %v1849_v56 = vmul.f32 %v2805_v24, %v1840_v34 }
 0xa54   : > { %v1850_v57 = vmul.f32 %v1849_v56, %v1011_v60 }
 0xa55   : > { %v2807_v19 = vpop.eup %2806 }
 0xa56   : > { %v2143_v20 = vmul.f32 %v2807_v19, %v2134_v45  ;;  %v1860_v58 = vrot.slane %v1850_v57, %v1272_v5  ;;  %v1880_v62 = vrot.slane %v1850_v57, %v1292_v9  ;;  %v3441_v61 = vrot.slane %v1850_v57, %v1266_v33 }
 0xa58   : > { %v2144_v2 = vmul.f32 %v2143_v20, %v1011_v60  ;;  %1862 = vrot.lane.b32.xlu1 %v1860_v58, %s2873_s13  ;;  %v1855_v8 = vmul.f32 %v3441_v61, %v3232_v63  ;;  %v1856_v49 = vmul.f32 %v3441_v61, %v3234_v7 }
 0xa5a   : > { %v2174_v53 = vrot.slane %v2144_v2, %v1292_v9  ;;  %v3444_v38 = vrot.slane %v2144_v2, %v1266_v33  ;;  %v2154_v25 = vrot.slane %v2144_v2, %v1272_v5 }
 0xa5c   : > { %1295 = vrot.lane.b32.xlu1 %v1293_v28, %s2875_s22  ;;  %v2149_v2 = vmul.f32 %v3444_v38, %v3239_v12 }
 0xa5d   : > { %v1283_v26 = vpop.permute.xlu0 %1282 }
 0xa5e   : > { %v1288_v4 = vadd.f32 %v1283_v26, %v1268_v32 }
 0xa60   : > { %1588 = vrot.lane.b32.xlu1 %v1586_v13, %s2875_s22 }
 0xa61   : > { %v1576_v27 = vpop.permute.xlu0 %1575 }
 0xa62   : > { %v1581_v46 = vadd.f32 %v1576_v27, %v1561_v42 }
 0xa64   : > { %1882 = vrot.lane.b32.xlu1 %v1880_v62, %s2875_s22 }
 0xa68   : > { %2156 = vrot.lane.b32.xlu1 %v2154_v25, %s2873_s13  ;;  %s380_s13 = sand.u32 1, %s2862_s18  }
 0xa69   : > { %s3527_s21 = scalar_lea.sflag [#allocation3], %s380_s13 }
 0xa6c   : > { %2176 = vrot.lane.b32.xlu1 %v2174_v53, %s2875_s22  ;;  %v2150_v53 = vmul.f32 %v3444_v38, %v3241_v15 }
 0xa70   : > { %1284 = vrot.lane.b32.xlu1 %v1279_v30, %s2874_s14 }
 0xa74   : > { %1577 = vrot.lane.b32.xlu1 %v1572_v1, %s2874_s14 }
 0xaca   : > { %v1863_v16 = vpop.permute.xlu1 %1862 }
 0xacb   : > { %v1865_v36 = vmul.f32 %v1863_v16, %v3232_v63  ;;  %v1866_v37 = vmul.f32 %v1863_v16, %v3234_v7 }
 0xacd   : > { %1871 = vrot.lane.b32.xlu1 %v1866_v37, %s2874_s14  ;;  %1869 = vrot.lane.b32.xlu0 %v1865_v36, %s2874_s14 }
 0xace   : > { %v1296_v51 = vpop.permute.xlu1 %1295 }
 0xacf   : > { %v1298_v39 = vmul.f32 %v1296_v51, %v3218_v54  ;;  %v1299_v0 = vmul.f32 %v1296_v51, %v3220_v55 }
 0xad1   : > { %1304 = vrot.lane.b32.xlu1 %v1299_v0, %s2875_s22  ;;  %1302 = vrot.lane.b32.xlu0 %v1298_v39, %s2875_s22 }
 0xad2   : > { %v1589_v11 = vpop.permute.xlu1 %1588 }
 0xad3   : > { %v1591_v14 = vmul.f32 %v1589_v11, %v3225_v52  ;;  %v1592_v40 = vmul.f32 %v1589_v11, %v3227_v59 }
 0xad5   : > { %1597 = vrot.lane.b32.xlu1 %v1592_v40, %s2875_s22  ;;  %1595 = vrot.lane.b32.xlu0 %v1591_v14, %s2875_s22 }
 0xad6   : > { %v1883_v17 = vpop.permute.xlu1 %1882 }
 0xad7   : > { %v1885_v18 = vmul.f32 %v1883_v17, %v3232_v63  ;;  %v1886_v60 = vmul.f32 %v1883_v17, %v3234_v7 }
 0xad9   : > { %1891 = vrot.lane.b32.xlu1 %v1886_v60, %s2875_s22  ;;  %1889 = vrot.lane.b32.xlu0 %v1885_v18, %s2875_s22 }
 0xada   : > { %v2157_v21 = vpop.permute.xlu1 %2156 }
 0xadb   : > { %v2159_v3 = vmul.f32 %v2157_v21, %v3239_v12  ;;  %v2160_v5 = vmul.f32 %v2157_v21, %v3241_v15 }
 0xadd   : > { %2165 = vrot.lane.b32.xlu1 %v2160_v5, %s2874_s14  ;;  %2163 = vrot.lane.b32.xlu0 %v2159_v3, %s2874_s14  ;;  %s2277_s14 = sshll.u32 %s380_s13, 6 }
 0xade   : > { %v2177_v9 = vpop.permute.xlu1 %2176 }
 0xadf   : > { %v2179_v33 = vmul.f32 %v2177_v9, %v3239_v12  ;;  %v2180_v23 = vmul.f32 %v2177_v9, %v3241_v15 }
 0xae1   : > { %2185 = vrot.lane.b32.xlu1 %v2180_v23, %s2875_s22  ;;  %2183 = vrot.lane.b32.xlu0 %v2179_v33, %s2875_s22  ;;  %s3494_s22 = scalar_lea.vmem [#allocation2], %s2277_s14  ;;  %s2812_s14 = sshll.u32 %s2879_s15, 4  ;;  %s2813_s14 = int_to_ptr.vmem [resolvable:$false] %s2812_s14 }
 0xae2   : > { %v1285_v10 = vpop.permute.xlu1 %1284  ;;  %s2211_s24 = sshll.u32 %s3494_s22, 4  ;;  %s2814_s16 = scalar_lea.vmem %s2813_s14, 2048  ;;  %s3519_s24 = int_to_ptr.vmem [resolvable:$true] %s2211_s24 }
 0xae3   : > { %v1289_v6 = vadd.f32 %v1285_v10, %v1269_v35  ;;  %s2808_s12 = scalar_lea.vmem %s3519_s24, 1024  ;;  %p2815_p0 = scmp.lt.s32.totalorder %s3519_s24, %s2813_s14 }
 0xae4   : > { %p2809_p11 = scmp.ne.s32.totalorder %s3519_s24, %s2808_s12  ;;  %p2816_p1 = scmp.lt.s32.totalorder %s2814_s16, %s2808_s12 }
 0xae6   : > { %v1578_v28 = vpop.permute.xlu1 %1577  ;;  %p2810_p12 = pnand %p2809_p11, %p2980_p5  ;;  %p2817_p2 = por %p2816_p1, %p2815_p0 }
 0xae7   : > { %v1582_v47 = vadd.f32 %v1578_v28, %v1562_v43 }
 0xae8   : > { %p2811_p13 = pneg %p2810_p12 }
 0xaea   : > { %p2818_p3 = pnand %p2817_p2, %p2811_p13 }
 0xb3f   : > { %v1870_v13 = vpop.permute.xlu0 %1869  ;;  %v1872_v31 = vpop.permute.xlu1 %1871 }
 0xb40   : > { %v1875_v29 = vadd.f32 %v1870_v13, %v1855_v8  ;;  %v1876_v50 = vadd.f32 %v1872_v31, %v1856_v49 }
 0xb43   : > { %v1303_v41 = vpop.permute.xlu0 %1302  ;;  %v1305_v34 = vpop.permute.xlu1 %1304 }
 0xb44   : > { %v1308_v44 = vadd.f32 %v1303_v41, %v1288_v4  ;;  %v1309_v45 = vadd.f32 %v1305_v34, %v1289_v6 }
 0xb46   : > { %v1310_v54 = vmul.f32 0.33333334, %v1308_v44  ;;  %v1311_v48 = vmul.f32 0.33333334, %v1309_v45 }
 0xb47   : > { %v1596_v22 = vpop.permute.xlu0 %1595  ;;  %v1598_v55 = vpop.permute.xlu1 %1597 }
 0xb48   : > { %1312 = vst.msk [vmem:[%s3494_s22] sm:$0xff] %vm580_vm4, %v1310_v54  ;;  %1313 = vst.msk [vmem:[%s3494_s22 + $0x8] sm:$0xff] %vm580_vm4, %v1311_v48  ;;  %v1601_v52 = vadd.f32 %v1596_v22, %v1581_v46  ;;  %v1602_v59 = vadd.f32 %v1598_v55, %v1582_v47 }
 0xb4a   : > { %v1603_v63 = vmul.f32 0.33333334, %v1601_v52  ;;  %v1604_v24 = vmul.f32 0.33333334, %v1602_v59 }
 0xb4b   : > { %v1890_v56 = vpop.permute.xlu0 %1889  ;;  %v1892_v7 = vpop.permute.xlu1 %1891 }
 0xb4c   : > { %2334 = vst.msk [vmem:[%s3494_s22 + $0x10] sm:$0xff] %vm580_vm4, %v1603_v63  ;;  %2335 = vst.msk [vmem:[%s3494_s22 + $0x18] sm:$0xff] %vm580_vm4, %v1604_v24  ;;  %v1895_v57 = vadd.f32 %v1890_v56, %v1875_v29  ;;  %v1896_v19 = vadd.f32 %v1892_v7, %v1876_v50 }
 0xb4e   : > { %v1897_v20 = vmul.f32 0.33333334, %v1895_v57  ;;  %v1898_v58 = vmul.f32 0.33333334, %v1896_v19 }
 0xb4f   : > { %v2164_v62 = vpop.permute.xlu0 %2163  ;;  %v2166_v61 = vpop.permute.xlu1 %2165 }
 0xb50   : > { %2348 = vst.msk [vmem:[%s3494_s22 + $0x20] sm:$0xff] %vm580_vm4, %v1897_v20  ;;  %2349 = vst.msk [vmem:[%s3494_s22 + $0x28] sm:$0xff] %vm580_vm4, %v1898_v58  ;;  %v2169_v25 = vadd.f32 %v2164_v62, %v2149_v2  ;;  %v2170_v30 = vadd.f32 %v2166_v61, %v2150_v53 }
 0xb53   : > { %v2184_v1 = vpop.permute.xlu0 %2183  ;;  %v2186_v16 = vpop.permute.xlu1 %2185 }
 0xb54   : > { %v2189_v36 = vadd.f32 %v2184_v1, %v2169_v25  ;;  %v2190_v37 = vadd.f32 %v2186_v16, %v2170_v30 }
 0xb56   : > { %v2191_v12 = vmul.f32 0.33333334, %v2189_v36  ;;  %v2192_v15 = vmul.f32 0.33333334, %v2190_v37 }
 0xb58   : > { %2362 = vst.msk [vmem:[%s3494_s22 + $0x30] sm:$0xff] %vm580_vm4, %v2191_v12  ;;  %2363 = vst.msk [vmem:[%s3494_s22 + $0x38] sm:$0xff] %vm580_vm4, %v2192_v15 }
 0xb59   : > { %2821 = shalt.err (!%p2818_p3)
}
 0xb5a   : > { %s2822_s13 = scalar_lea.hbm %s3517_s29, 1024  ;;  %s2826_s30 = scalar_lea.hbm %s3579_s11, 2048 }
 0xb5b   : > { %p2823_p4 = scmp.ne.s32.totalorder %s3517_s29, %s2822_s13  ;;  %p2827_p9 = scmp.lt.u32.totalorder %s3517_s29, %s3579_s11 }
 0xb5c   : > { %p2828_p10 = scmp.lt.u32.totalorder %s2826_s30, %s2822_s13  ;;  %p2830_p12 = scmp.lt.u32.totalorder %s2822_s13, %s3517_s29 }
 0xb5d   : > { %p2824_p7 = pnand %p2823_p4, %p2980_p5 }
 0xb5e   : > { %p2829_p11 = por %p2828_p10, %p2827_p9 }
 0xb5f   : > { %p2825_p8 = pneg %p2824_p7 }
 0xb60   : > { %p2831_p13 = por %p2830_p12, %p2829_p11 }
 0xb62   : > { %p2832_p0 = pnand %p2831_p13, %p2825_p8 }
 0xb64   : > { %2835 = shalt.err (!%p2832_p0)
}
 0xb65   : > { %s2880_s12 = smov 128   ;;  %s2881_s16 = smov 8  }
 0xb66   : > { %2541 = dma.vmem_to_hbm [thread:$0]  (%p2980_p5), %s3519_s24, 1024, %s3517_s29, %s3527_s21, %s2880_s12, %s2880_s12, %s2881_s16  }
 0xb67 PF: > { %p2547_p1 = scmp.ge.s32.totalorder %s2870_s20, 2  ;;  %s2226_s22 = sand.u32 1, %s2858_s17  }
 0xb68   : > { %s2227_s13 = scalar_lea.sflag [#allocation3], %s2226_s22 }
 0xb69   : > { %p2544_p2 = pnand %p2547_p1, %p2984_p6 }
 0xb6b   : > { %2853 = dma.done.wait (!%p2544_p2), %s2227_s13, 1024  }
 0xb6c   : > { %2855 = vsyncadd (!%p2544_p2), %s2227_s13, 4294966272  ;;  %p21_p3 = scmp.ge.s32.totalorder %s2967_s23, 4   ;;  %s3584_s17 = smov %s2862_s18 }
 0xb6d   : > { %s3585_s18 = smov %s2866_s19  ;;  %s3586_s19 = smov %s2978_s26 }
 0xb6e   : > { %s3587_s20 = smov %s2967_s23  ;;  %23 = sbr.rel (!%p21_p3) target bundleno = 3 (0x3), region = 102 }
 0xb75   :  { %2232 = vsyncpa [#allocation3], 1 }
 0xb76   :  { %2234 = vsyncpa [#allocation3 + $0x1], 1 }

</bundles_post_ra>
